<compile_context>
chip_gen: v7x
topology: tpu7x:2x2x1
jax: 0.10.0
libtpu: 0.0.40
codegen_flags: <defaults>
</compile_context>

<pallas_src>
import jax
import jax.numpy as jnp
from jax.experimental import pallas as pl
from jax.experimental.pallas import tpu as pltpu


# ---------------------------------------------------------------------------
# Fused forward kernel (one batch tile per grid step, everything in VMEM)
# ---------------------------------------------------------------------------
def _net_kernel(x_ref, w1_ref, b1_ref, w2_ref, b2_ref,
                wfc1_ref, bfc1_ref, wfc2_ref, bfc2_ref, o_ref):
    """Whole Net forward for one batch tile.

    x_ref  : (24, BT, 140) bf16  H-im2col input, last dim = di*28 + w (5 row shifts)
    w1     : (140, 256)    bf16  conv1 Toeplitz, lanes [0:128)=even cols, [128:256)=odd
    b1     : (1, 128)      f32   conv1 bias tiled over 12 pooled cols (lane = jo*10+co), pad 0
    w2     : (5, 128, 256) bf16  conv2 Toeplitz per H-shift, K padded 120->128, parity-merged lanes
    b2     : (1, 128)      f32   conv2 bias tiled over 4 pooled cols (lane = j2o*20+co), pad 0
    wfc1   : (4, 128, 50)  bf16  fc1 split over the 4 pooled rows (NCHW flatten folded), K pad 80->128
    wfc2   : (50, 128)     bf16  fc2, lanes padded 10->128 with zeros
    bfc1   : (1, 50) f32 ; bfc2 : (1, 128) f32 (pad lanes = -1e30 so log_softmax ignores them)
    o_ref  : (BT, 128)     f32   log-probabilities in lanes [0:10)
    """
    bt = o_ref.shape[0]
    f32 = jnp.float32
    bf16 = jnp.bfloat16

    # ---- conv1: single Toeplitz matmul (H-shifts folded into K by the wrapper);
    # even/odd output-column parities live in lane halves of the merged weight.
    xs = x_ref[...].reshape(24 * bt, 140)                        # rows = (i, b)
    a = jnp.dot(xs, w1_ref[...], preferred_element_type=f32)     # (24*bt, 256) f32
    # 2x2 max-pool + bias + relu (per-channel bias commutes with max; relu after,
    # as in PyTorch).  W-pool = max of the two lane-tile-aligned parity halves;
    # H-pool = layout-preserving row-pair max (rows are (i, b), bt % 8 == 0).
    a = jnp.maximum(a[:, :128], a[:, 128:]) + b1_ref[...]        # (24*bt, 128)
    a4 = a.reshape(12, 2, bt, 128)
    p1 = jnp.maximum(jnp.maximum(a4[:, 0], a4[:, 1]), 0.0).astype(bf16)   # (12, BT, 128)

    # ---- conv2: 5 row-shift Toeplitz matmuls, parity-merged 256-lane output ----
    # TODO(synk): nn.Dropout2d is identity in eval mode; no channel-dropout RNG in-kernel.
    acc = jnp.dot(p1[0:8].reshape(8 * bt, 128), w2_ref[0], preferred_element_type=f32)
    for di in range(1, 5):
        ps = p1[di:di + 8].reshape(8 * bt, 128)                  # rows = (i2, b)
        acc = acc + jnp.dot(ps, w2_ref[di], preferred_element_type=f32)
    b = jnp.maximum(acc[:, :128], acc[:, 128:]) + b2_ref[...]    # (8*bt, 128)
    b4 = b.reshape(4, 2, bt, 128)
    p2 = jnp.maximum(jnp.maximum(b4[:, 0], b4[:, 1]), 0.0).astype(bf16)   # (4, BT, 128)

    # ---- fc1 + relu, fc2, 128-lane log_softmax --------------------------------
    h = jnp.dot(p2[0], wfc1_ref[0], preferred_element_type=f32)
    for r in range(1, 4):                                        # sum over the 4 pooled rows
        h = h + jnp.dot(p2[r], wfc1_ref[r], preferred_element_type=f32)
    h = jnp.maximum(h + bfc1_ref[...], 0.0).astype(bf16)
    # TODO(synk): F.dropout is identity in eval mode; no RNG dropout in-kernel.
    logits = jnp.dot(h, wfc2_ref[...], preferred_element_type=f32) + bfc2_ref[...]
    # Pad lanes carry -1e30 from bfc2, so they never win the max and exp() == 0.
    m = jnp.max(logits, axis=-1, keepdims=True)
    s = logits - m
    lse = jnp.log(jnp.sum(jnp.exp(s), axis=-1, keepdims=True))
    o_ref[...] = s - lse


# ---------------------------------------------------------------------------
# Weight prep (trace-time, tiny): fold im2col + pooling parity + NCHW flatten
# into the weight matrices so the kernel only does dense matmuls.
# ---------------------------------------------------------------------------
def _conv1_toeplitz(w1, parity):
    """w1: (5,5,10) [di,dj,co] -> (5,28,120); T[di, w_in, jo*10+co] = w1[di, w_in-(2jo+parity), co]."""
    w_in = jnp.arange(28)[:, None]
    j = 2 * jnp.arange(12)[None, :] + parity
    dj = w_in - j
    valid = (dj >= 0) & (dj <= 4)
    djc = jnp.clip(dj, 0, 4)
    t = w1[:, djc, :]                                       # (5, 28, 12, 10)
    t = jnp.where(valid[None, :, :, None], t, 0.0)
    return t.reshape(5, 28, 120)                            # lane order = jo*10 + co


def _conv2_toeplitz(w2, parity):
    """w2: (5,5,10,20) -> (5,120,80); T[di, w*10+ci, j2o*20+co] = w2[di, w-(2*j2o+parity), ci, co]."""
    w_idx = jnp.arange(12)[:, None]
    j2 = 2 * jnp.arange(4)[None, :] + parity
    dj = w_idx - j2
    valid = (dj >= 0) & (dj <= 4)
    djc = jnp.clip(dj, 0, 4)
    t = w2[:, djc, :, :]                                    # (5, 12, 4, 10, 20)
    t = jnp.where(valid[None, :, :, None, None], t, 0.0)
    t = jnp.transpose(t, (0, 1, 3, 2, 4))                   # (5, 12, 10, 4, 20)
    return t.reshape(5, 120, 80)                            # K = w*10+ci, lane = j2o*20+co


def _pack_params(params):
    f32, bf16 = jnp.float32, jnp.bfloat16
    w1 = params["conv1_w"][:, :, 0, :]                      # (5,5,10), Cin == 1
    w2 = params["conv2_w"]                                  # (5,5,10,20)

    # conv1: merge even/odd parity into one 256-lane weight (each half padded
    # 120->128), and fold the 5 H-shifts into K: row index = di*28 + w_in.
    w1e = jnp.pad(_conv1_toeplitz(w1, 0), ((0, 0), (0, 0), (0, 8)))   # (5,28,128)
    w1o = jnp.pad(_conv1_toeplitz(w1, 1), ((0, 0), (0, 0), (0, 8)))
    w1cat = jnp.concatenate([w1e, w1o], axis=-1).reshape(140, 256)

    # conv2: parity-merged per H-shift; K padded 120 -> 128 (matches p1's zero pad lanes).
    w2e = jnp.pad(_conv2_toeplitz(w2, 0), ((0, 0), (0, 8), (0, 48)))  # (5,128,128)
    w2o = jnp.pad(_conv2_toeplitz(w2, 1), ((0, 0), (0, 8), (0, 48)))
    w2cat = jnp.concatenate([w2e, w2o], axis=-1)                      # (5,128,256)

    # fc1: PyTorch NCHW flatten order (c,h,w) folded in and split over the 4
    # pooled rows h -> (4, w*20+c, 50), matching p2's lane order j2o*20+co;
    # K padded 80 -> 128.
    wfc1 = jnp.transpose(params["fc1_w"].reshape(20, 4, 4, 50), (1, 2, 0, 3)).reshape(4, 80, 50)
    wfc1 = jnp.pad(wfc1, ((0, 0), (0, 48), (0, 0)))                   # (4,128,50)

    # fc2: lanes padded 10 -> 128 (zeros); pad lanes of the bias get -1e30 so the
    # in-kernel 128-lane log_softmax ignores them.
    wfc2 = jnp.pad(params["fc2_w"], ((0, 0), (0, 118)))               # (50,128)
    bfc2 = jnp.pad(params["fc2_b"], (0, 118), constant_values=-1e30).reshape(1, 128)

    # NOTE: bias tiling order must match the Toeplitz lane orders above:
    # conv1 lanes = jo*10+co, conv2 lanes = j2o*20+co.
    b1 = jnp.pad(jnp.tile(params["conv1_b"], 12), (0, 8)).reshape(1, 128)
    b2 = jnp.pad(jnp.tile(params["conv2_b"], 4), (0, 48)).reshape(1, 128)

    return dict(
        w1=w1cat.astype(bf16), b1=b1.astype(f32),
        w2=w2cat.astype(bf16), b2=b2.astype(f32),
        wfc1=wfc1.astype(bf16), bfc1=params["fc1_b"].reshape(1, 50).astype(f32),
        wfc2=wfc2.astype(bf16), bfc2=bfc2.astype(f32),
    )


# ---------------------------------------------------------------------------
# pallas_call wrapper
# ---------------------------------------------------------------------------
def _round_up(x, m):
    return (x + m - 1) // m * m


def _fixed_spec(shape):
    zeros = (0,) * len(shape)
    return pl.BlockSpec(shape, lambda i: zeros)


def net_forward(params, x_nchw, *, block_batch=128):
    """x_nchw: (N, 1, 28, 28) -> (N, 10) log-probabilities."""
    assert block_batch % 8 == 0  # keeps the in-kernel row merges layout-preserving
    pk = _pack_params(params)

    n = x_nchw.shape[0]
    x = x_nchw.reshape(n, 28, 28).astype(jnp.float32)       # Cin == 1: reshape, not transpose

    # Batch tile: multiple of 8, <= block_batch, and small enough that the grid
    # has >= 2 steps whenever the batch allows it (keeps both v7x TCs busy).
    bt = min(block_batch, max(8, (n // 2) // 8 * 8))
    n_pad = _round_up(max(n, 1), bt)

    # Fold conv1's 5 H-shifts into the contraction: present the input as
    # (24, N, 140) bf16 with last-dim index di*28 + w (rows i..i+4 of the image),
    # so conv1 is ONE (24*bt,140)@(140,256) matmul per tile.  H leading keeps the
    # in-kernel (rows, BT, 140) -> (rows*BT, 140) merge layout-preserving.
    xs = jnp.stack([x[:, di:di + 24, :] for di in range(5)], axis=2)   # (N,24,5,28)
    x_t = jnp.transpose(xs, (1, 0, 2, 3)).reshape(24, n, 140).astype(jnp.bfloat16)
    if n_pad != n:
        x_t = jnp.pad(x_t, ((0, 0), (0, n_pad - n), (0, 0)))

    grid_spec = pltpu.PrefetchScalarGridSpec(
        num_scalar_prefetch=0,
        grid=(n_pad // bt,),
        in_specs=[
            pl.BlockSpec((24, bt, 140), lambda i: (0, i, 0)),   # input tile
            _fixed_spec((140, 256)), _fixed_spec((1, 128)),     # conv1 W / b
            _fixed_spec((5, 128, 256)), _fixed_spec((1, 128)),  # conv2 W / b
            _fixed_spec((4, 128, 50)), _fixed_spec((1, 50)),    # fc1 W / b
            _fixed_spec((50, 128)), _fixed_spec((1, 128)),      # fc2 W / b
        ],
        out_specs=pl.BlockSpec((bt, 128), lambda i: (i, 0)),    # lane-dense output
    )
    out = pl.pallas_call(
        _net_kernel,
        out_shape=jax.ShapeDtypeStruct((n_pad, 128), jnp.float32),
        grid_spec=grid_spec,
        compiler_params=pltpu.CompilerParams(
            dimension_semantics=("parallel",),                  # batch axis -> both TCs on v7x
            vmem_limit_bytes=40 * 1024 * 1024,                  # headroom for big tiles on v5e
        ),
    )(x_t, pk["w1"], pk["b1"], pk["w2"], pk["b2"],
      pk["wfc1"], pk["bfc1"], pk["wfc2"], pk["bfc2"])
    return out[:n, :10]


# ---------------------------------------------------------------------------
# Parameters + a plain-JAX reference (for correctness cross-check only)
# ---------------------------------------------------------------------------
def init_params(key):
    ks = jax.random.split(key, 8)
    return {
        "conv1_w": 0.1 * jax.random.normal(ks[0], (5, 5, 1, 10), jnp.float32),
        "conv1_b": 0.1 * jax.random.normal(ks[1], (10,), jnp.float32),
        "conv2_w": 0.05 * jax.random.normal(ks[2], (5, 5, 10, 20), jnp.float32),
        "conv2_b": 0.05 * jax.random.normal(ks[3], (20,), jnp.float32),
        "fc1_w": 0.05 * jax.random.normal(ks[4], (320, 50), jnp.float32),
        "fc1_b": 0.05 * jax.random.normal(ks[5], (50,), jnp.float32),
        "fc2_w": 0.1 * jax.random.normal(ks[6], (50, 10), jnp.float32),
        "fc2_b": 0.1 * jax.random.normal(ks[7], (10,), jnp.float32),
    }


def _reference_forward(params, x_nchw):
    x = jnp.transpose(x_nchw, (0, 2, 3, 1)).astype(jnp.float32)

    def conv(x, w, b):
        y = jax.lax.conv_general_dilated(
            x, w, (1, 1), "VALID", dimension_numbers=("NHWC", "HWIO", "NHWC"))
        return y + b

    def pool_relu(y):
        m = jnp.maximum(jnp.maximum(y[:, 0::2, 0::2, :], y[:, 0::2, 1::2, :]),
                        jnp.maximum(y[:, 1::2, 0::2, :], y[:, 1::2, 1::2, :]))
        return jnp.maximum(m, 0.0)

    y = pool_relu(conv(x, params["conv1_w"], params["conv1_b"]))
    y = pool_relu(conv(y, params["conv2_w"], params["conv2_b"]))
    flat = jnp.transpose(y, (0, 3, 1, 2)).reshape(x.shape[0], 320)   # NCHW flatten
    h = jnp.maximum(flat @ params["fc1_w"] + params["fc1_b"], 0.0)
    logits = h @ params["fc2_w"] + params["fc2_b"]
    return jax.nn.log_softmax(logits, axis=-1)


if __name__ == "__main__":
    key = jax.random.PRNGKey(0)
    pkey, xkey = jax.random.split(key)
    params = init_params(pkey)

    # The forward pass implies a 1x28x28 input (20*4*4 = 320 after two conv+pool stages).
    x = jax.random.normal(xkey, (2, 1, 28, 28), jnp.float32)

    fwd = jax.jit(net_forward)
    out = jax.block_until_ready(fwd(params, x))

    assert out.shape == (2, 10)
    # log_softmax rows should (approximately) sum to 1 in probability space.
    assert bool(jnp.all(jnp.abs(jnp.sum(jnp.exp(out), axis=1) - 1.0) < 1e-3))
    # Cross-check against a plain-JAX f32 reference (kernel uses bf16 weights/acts
    # with f32 accumulation, so a ~1e-2 tolerance is the expected regime).
    ref = _reference_forward(params, x)
    assert bool(jnp.max(jnp.abs(out - ref)) < 2e-2)
    print("KERNEL_OK")
</pallas_src>

<mosaic_0001>
module attributes {stable_mosaic.version = 11 : i64} {
  func.func @_net_kernel(%arg0: i32, %arg1: memref<24x8x140xbf16, #tpu.memory_space<vmem>>, %arg2: memref<140x256xbf16, #tpu.memory_space<vmem>>, %arg3: memref<1x128xf32, #tpu.memory_space<vmem>>, %arg4: memref<5x128x256xbf16, #tpu.memory_space<vmem>>, %arg5: memref<1x128xf32, #tpu.memory_space<vmem>>, %arg6: memref<4x128x50xbf16, #tpu.memory_space<vmem>>, %arg7: memref<1x50xf32, #tpu.memory_space<vmem>>, %arg8: memref<50x128xbf16, #tpu.memory_space<vmem>>, %arg9: memref<1x128xf32, #tpu.memory_space<vmem>>, %arg10: memref<8x128xf32, #tpu.memory_space<vmem>>) attributes {dimension_semantics = [#tpu.dimension_semantics<parallel>], iteration_bounds = array<i64: 1>, scalar_prefetch = 0 : i64, scratch_operands = 0 : i64, tpu.core_type = #tpu.core_type<tc>, window_params = [{transform_indices = @transform_0, window_bounds = array<i64: 24, 8, 140>}, {pipeline_mode = #tpu.pipeline_mode<synchronous>, transform_indices = @transform_1, window_bounds = array<i64: 140, 256>}, {pipeline_mode = #tpu.pipeline_mode<synchronous>, transform_indices = @transform_2, window_bounds = array<i64: 1, 128>}, {pipeline_mode = #tpu.pipeline_mode<synchronous>, transform_indices = @transform_3, window_bounds = array<i64: 5, 128, 256>}, {pipeline_mode = #tpu.pipeline_mode<synchronous>, transform_indices = @transform_4, window_bounds = array<i64: 1, 128>}, {pipeline_mode = #tpu.pipeline_mode<synchronous>, transform_indices = @transform_5, window_bounds = array<i64: 4, 128, 50>}, {pipeline_mode = #tpu.pipeline_mode<synchronous>, transform_indices = @transform_6, window_bounds = array<i64: 1, 50>}, {pipeline_mode = #tpu.pipeline_mode<synchronous>, transform_indices = @transform_7, window_bounds = array<i64: 50, 128>}, {pipeline_mode = #tpu.pipeline_mode<synchronous>, transform_indices = @transform_8, window_bounds = array<i64: 1, 128>}, {transform_indices = @transform_9, window_bounds = array<i64: 8, 128>}]} {
    %c0 = arith.constant 0 : index
    %c0_0 = arith.constant 0 : index
    %c0_1 = arith.constant 0 : index
    %0 = vector.load %arg1[%c0, %c0_0, %c0_1] : memref<24x8x140xbf16, #tpu.memory_space<vmem>>, vector<24x8x140xbf16>
    %1 = vector.shape_cast %0 : vector<24x8x140xbf16> to vector<192x140xbf16>
    %c0_2 = arith.constant 0 : index
    %c0_3 = arith.constant 0 : index
    %2 = vector.load %arg2[%c0_2, %c0_3] : memref<140x256xbf16, #tpu.memory_space<vmem>>, vector<140x256xbf16>
    %cst = arith.constant dense<0.000000e+00> : vector<192x256xf32>
    %3 = tpu.matmul %1, %2, %cst {dimension_numbers = #tpu.dot_dimension_numbers<[1], [0], [0], [1], [0, 0, 1, 1], [], []>} : vector<192x140xbf16>, vector<140x256xbf16>, vector<192x256xf32> -> vector<192x256xf32>
    %4 = vector.extract_strided_slice %3 {offsets = [0, 0], sizes = [192, 128], strides = [1, 1]} : vector<192x256xf32> to vector<192x128xf32>
    %5 = vector.extract_strided_slice %3 {offsets = [0, 128], sizes = [192, 128], strides = [1, 1]} : vector<192x256xf32> to vector<192x128xf32>
    %6 = arith.maximumf %4, %5 : vector<192x128xf32>
    %c0_4 = arith.constant 0 : index
    %c0_5 = arith.constant 0 : index
    %7 = vector.load %arg3[%c0_4, %c0_5] : memref<1x128xf32, #tpu.memory_space<vmem>>, vector<1x128xf32>
    %8 = vector.broadcast %7 : vector<1x128xf32> to vector<192x128xf32>
    %9 = arith.addf %6, %8 : vector<192x128xf32>
    %10 = vector.shape_cast %9 : vector<192x128xf32> to vector<12x2x8x128xf32>
    %11 = vector.extract_strided_slice %10 {offsets = [0, 0, 0, 0], sizes = [12, 1, 8, 128], strides = [1, 1, 1, 1]} : vector<12x2x8x128xf32> to vector<12x1x8x128xf32>
    %12 = vector.shape_cast %11 : vector<12x1x8x128xf32> to vector<12x8x128xf32>
    %13 = vector.extract_strided_slice %10 {offsets = [0, 1, 0, 0], sizes = [12, 1, 8, 128], strides = [1, 1, 1, 1]} : vector<12x2x8x128xf32> to vector<12x1x8x128xf32>
    %14 = vector.shape_cast %13 : vector<12x1x8x128xf32> to vector<12x8x128xf32>
    %15 = arith.maximumf %12, %14 : vector<12x8x128xf32>
    %cst_6 = arith.constant 0.000000e+00 : f32
    %16 = vector.broadcast %cst_6 : f32 to vector<12x8x128xf32>
    %17 = arith.maximumf %15, %16 : vector<12x8x128xf32>
    %18 = arith.truncf %17 : vector<12x8x128xf32> to vector<12x8x128xbf16>
    %19 = vector.extract_strided_slice %18 {offsets = [0, 0, 0], sizes = [8, 8, 128], strides = [1, 1, 1]} : vector<12x8x128xbf16> to vector<8x8x128xbf16>
    %20 = vector.shape_cast %19 : vector<8x8x128xbf16> to vector<64x128xbf16>
    %c0_7 = arith.constant 0 : index
    %c0_8 = arith.constant 0 : index
    %c0_9 = arith.constant 0 : index
    %21 = vector.load %arg4[%c0_7, %c0_8, %c0_9] : memref<5x128x256xbf16, #tpu.memory_space<vmem>>, vector<1x128x256xbf16>
    %22 = vector.shape_cast %21 : vector<1x128x256xbf16> to vector<128x256xbf16>
    %cst_10 = arith.constant dense<0.000000e+00> : vector<64x256xf32>
    %23 = tpu.matmul %20, %22, %cst_10 {dimension_numbers = #tpu.dot_dimension_numbers<[1], [0], [0], [1], [0, 0, 1, 1], [], []>} : vector<64x128xbf16>, vector<128x256xbf16>, vector<64x256xf32> -> vector<64x256xf32>
    %24 = vector.extract_strided_slice %18 {offsets = [1, 0, 0], sizes = [8, 8, 128], strides = [1, 1, 1]} : vector<12x8x128xbf16> to vector<8x8x128xbf16>
    %25 = vector.shape_cast %24 : vector<8x8x128xbf16> to vector<64x128xbf16>
    %c1 = arith.constant 1 : index
    %c0_11 = arith.constant 0 : index
    %c0_12 = arith.constant 0 : index
    %26 = vector.load %arg4[%c1, %c0_11, %c0_12] : memref<5x128x256xbf16, #tpu.memory_space<vmem>>, vector<1x128x256xbf16>
    %27 = vector.shape_cast %26 : vector<1x128x256xbf16> to vector<128x256xbf16>
    %cst_13 = arith.constant dense<0.000000e+00> : vector<64x256xf32>
    %28 = tpu.matmul %25, %27, %cst_13 {dimension_numbers = #tpu.dot_dimension_numbers<[1], [0], [0], [1], [0, 0, 1, 1], [], []>} : vector<64x128xbf16>, vector<128x256xbf16>, vector<64x256xf32> -> vector<64x256xf32>
    %29 = arith.addf %23, %28 : vector<64x256xf32>
    %30 = vector.extract_strided_slice %18 {offsets = [2, 0, 0], sizes = [8, 8, 128], strides = [1, 1, 1]} : vector<12x8x128xbf16> to vector<8x8x128xbf16>
    %31 = vector.shape_cast %30 : vector<8x8x128xbf16> to vector<64x128xbf16>
    %c2 = arith.constant 2 : index
    %c0_14 = arith.constant 0 : index
    %c0_15 = arith.constant 0 : index
    %32 = vector.load %arg4[%c2, %c0_14, %c0_15] : memref<5x128x256xbf16, #tpu.memory_space<vmem>>, vector<1x128x256xbf16>
    %33 = vector.shape_cast %32 : vector<1x128x256xbf16> to vector<128x256xbf16>
    %cst_16 = arith.constant dense<0.000000e+00> : vector<64x256xf32>
    %34 = tpu.matmul %31, %33, %cst_16 {dimension_numbers = #tpu.dot_dimension_numbers<[1], [0], [0], [1], [0, 0, 1, 1], [], []>} : vector<64x128xbf16>, vector<128x256xbf16>, vector<64x256xf32> -> vector<64x256xf32>
    %35 = arith.addf %29, %34 : vector<64x256xf32>
    %36 = vector.extract_strided_slice %18 {offsets = [3, 0, 0], sizes = [8, 8, 128], strides = [1, 1, 1]} : vector<12x8x128xbf16> to vector<8x8x128xbf16>
    %37 = vector.shape_cast %36 : vector<8x8x128xbf16> to vector<64x128xbf16>
    %c3 = arith.constant 3 : index
    %c0_17 = arith.constant 0 : index
    %c0_18 = arith.constant 0 : index
    %38 = vector.load %arg4[%c3, %c0_17, %c0_18] : memref<5x128x256xbf16, #tpu.memory_space<vmem>>, vector<1x128x256xbf16>
    %39 = vector.shape_cast %38 : vector<1x128x256xbf16> to vector<128x256xbf16>
    %cst_19 = arith.constant dense<0.000000e+00> : vector<64x256xf32>
    %40 = tpu.matmul %37, %39, %cst_19 {dimension_numbers = #tpu.dot_dimension_numbers<[1], [0], [0], [1], [0, 0, 1, 1], [], []>} : vector<64x128xbf16>, vector<128x256xbf16>, vector<64x256xf32> -> vector<64x256xf32>
    %41 = arith.addf %35, %40 : vector<64x256xf32>
    %42 = vector.extract_strided_slice %18 {offsets = [4, 0, 0], sizes = [8, 8, 128], strides = [1, 1, 1]} : vector<12x8x128xbf16> to vector<8x8x128xbf16>
    %43 = vector.shape_cast %42 : vector<8x8x128xbf16> to vector<64x128xbf16>
    %c4 = arith.constant 4 : index
    %c0_20 = arith.constant 0 : index
    %c0_21 = arith.constant 0 : index
    %44 = vector.load %arg4[%c4, %c0_20, %c0_21] : memref<5x128x256xbf16, #tpu.memory_space<vmem>>, vector<1x128x256xbf16>
    %45 = vector.shape_cast %44 : vector<1x128x256xbf16> to vector<128x256xbf16>
    %cst_22 = arith.constant dense<0.000000e+00> : vector<64x256xf32>
    %46 = tpu.matmul %43, %45, %cst_22 {dimension_numbers = #tpu.dot_dimension_numbers<[1], [0], [0], [1], [0, 0, 1, 1], [], []>} : vector<64x128xbf16>, vector<128x256xbf16>, vector<64x256xf32> -> vector<64x256xf32>
    %47 = arith.addf %41, %46 : vector<64x256xf32>
    %48 = vector.extract_strided_slice %47 {offsets = [0, 0], sizes = [64, 128], strides = [1, 1]} : vector<64x256xf32> to vector<64x128xf32>
    %49 = vector.extract_strided_slice %47 {offsets = [0, 128], sizes = [64, 128], strides = [1, 1]} : vector<64x256xf32> to vector<64x128xf32>
    %50 = arith.maximumf %48, %49 : vector<64x128xf32>
    %c0_23 = arith.constant 0 : index
    %c0_24 = arith.constant 0 : index
    %51 = vector.load %arg5[%c0_23, %c0_24] : memref<1x128xf32, #tpu.memory_space<vmem>>, vector<1x128xf32>
    %52 = vector.broadcast %51 : vector<1x128xf32> to vector<64x128xf32>
    %53 = arith.addf %50, %52 : vector<64x128xf32>
    %54 = vector.shape_cast %53 : vector<64x128xf32> to vector<4x2x8x128xf32>
    %55 = vector.extract_strided_slice %54 {offsets = [0, 0, 0, 0], sizes = [4, 1, 8, 128], strides = [1, 1, 1, 1]} : vector<4x2x8x128xf32> to vector<4x1x8x128xf32>
    %56 = vector.shape_cast %55 : vector<4x1x8x128xf32> to vector<4x8x128xf32>
    %57 = vector.extract_strided_slice %54 {offsets = [0, 1, 0, 0], sizes = [4, 1, 8, 128], strides = [1, 1, 1, 1]} : vector<4x2x8x128xf32> to vector<4x1x8x128xf32>
    %58 = vector.shape_cast %57 : vector<4x1x8x128xf32> to vector<4x8x128xf32>
    %59 = arith.maximumf %56, %58 : vector<4x8x128xf32>
    %cst_25 = arith.constant 0.000000e+00 : f32
    %60 = vector.broadcast %cst_25 : f32 to vector<4x8x128xf32>
    %61 = arith.maximumf %59, %60 : vector<4x8x128xf32>
    %62 = arith.truncf %61 : vector<4x8x128xf32> to vector<4x8x128xbf16>
    %63 = vector.extract_strided_slice %62 {offsets = [0, 0, 0], sizes = [1, 8, 128], strides = [1, 1, 1]} : vector<4x8x128xbf16> to vector<1x8x128xbf16>
    %64 = vector.shape_cast %63 : vector<1x8x128xbf16> to vector<8x128xbf16>
    %c0_26 = arith.constant 0 : index
    %c0_27 = arith.constant 0 : index
    %c0_28 = arith.constant 0 : index
    %65 = vector.load %arg6[%c0_26, %c0_27, %c0_28] : memref<4x128x50xbf16, #tpu.memory_space<vmem>>, vector<1x128x50xbf16>
    %66 = vector.shape_cast %65 : vector<1x128x50xbf16> to vector<128x50xbf16>
    %cst_29 = arith.constant dense<0.000000e+00> : vector<8x50xf32>
    %67 = tpu.matmul %64, %66, %cst_29 {dimension_numbers = #tpu.dot_dimension_numbers<[1], [0], [0], [1], [0, 0, 1, 1], [], []>} : vector<8x128xbf16>, vector<128x50xbf16>, vector<8x50xf32> -> vector<8x50xf32>
    %68 = vector.extract_strided_slice %62 {offsets = [1, 0, 0], sizes = [1, 8, 128], strides = [1, 1, 1]} : vector<4x8x128xbf16> to vector<1x8x128xbf16>
    %69 = vector.shape_cast %68 : vector<1x8x128xbf16> to vector<8x128xbf16>
    %c1_30 = arith.constant 1 : index
    %c0_31 = arith.constant 0 : index
    %c0_32 = arith.constant 0 : index
    %70 = vector.load %arg6[%c1_30, %c0_31, %c0_32] : memref<4x128x50xbf16, #tpu.memory_space<vmem>>, vector<1x128x50xbf16>
    %71 = vector.shape_cast %70 : vector<1x128x50xbf16> to vector<128x50xbf16>
    %cst_33 = arith.constant dense<0.000000e+00> : vector<8x50xf32>
    %72 = tpu.matmul %69, %71, %cst_33 {dimension_numbers = #tpu.dot_dimension_numbers<[1], [0], [0], [1], [0, 0, 1, 1], [], []>} : vector<8x128xbf16>, vector<128x50xbf16>, vector<8x50xf32> -> vector<8x50xf32>
    %73 = arith.addf %67, %72 : vector<8x50xf32>
    %74 = vector.extract_strided_slice %62 {offsets = [2, 0, 0], sizes = [1, 8, 128], strides = [1, 1, 1]} : vector<4x8x128xbf16> to vector<1x8x128xbf16>
    %75 = vector.shape_cast %74 : vector<1x8x128xbf16> to vector<8x128xbf16>
    %c2_34 = arith.constant 2 : index
    %c0_35 = arith.constant 0 : index
    %c0_36 = arith.constant 0 : index
    %76 = vector.load %arg6[%c2_34, %c0_35, %c0_36] : memref<4x128x50xbf16, #tpu.memory_space<vmem>>, vector<1x128x50xbf16>
    %77 = vector.shape_cast %76 : vector<1x128x50xbf16> to vector<128x50xbf16>
    %cst_37 = arith.constant dense<0.000000e+00> : vector<8x50xf32>
    %78 = tpu.matmul %75, %77, %cst_37 {dimension_numbers = #tpu.dot_dimension_numbers<[1], [0], [0], [1], [0, 0, 1, 1], [], []>} : vector<8x128xbf16>, vector<128x50xbf16>, vector<8x50xf32> -> vector<8x50xf32>
    %79 = arith.addf %73, %78 : vector<8x50xf32>
    %80 = vector.extract_strided_slice %62 {offsets = [3, 0, 0], sizes = [1, 8, 128], strides = [1, 1, 1]} : vector<4x8x128xbf16> to vector<1x8x128xbf16>
    %81 = vector.shape_cast %80 : vector<1x8x128xbf16> to vector<8x128xbf16>
    %c3_38 = arith.constant 3 : index
    %c0_39 = arith.constant 0 : index
    %c0_40 = arith.constant 0 : index
    %82 = vector.load %arg6[%c3_38, %c0_39, %c0_40] : memref<4x128x50xbf16, #tpu.memory_space<vmem>>, vector<1x128x50xbf16>
    %83 = vector.shape_cast %82 : vector<1x128x50xbf16> to vector<128x50xbf16>
    %cst_41 = arith.constant dense<0.000000e+00> : vector<8x50xf32>
    %84 = tpu.matmul %81, %83, %cst_41 {dimension_numbers = #tpu.dot_dimension_numbers<[1], [0], [0], [1], [0, 0, 1, 1], [], []>} : vector<8x128xbf16>, vector<128x50xbf16>, vector<8x50xf32> -> vector<8x50xf32>
    %85 = arith.addf %79, %84 : vector<8x50xf32>
    %c0_42 = arith.constant 0 : index
    %c0_43 = arith.constant 0 : index
    %86 = vector.load %arg7[%c0_42, %c0_43] : memref<1x50xf32, #tpu.memory_space<vmem>>, vector<1x50xf32>
    %87 = vector.broadcast %86 : vector<1x50xf32> to vector<8x50xf32>
    %88 = arith.addf %85, %87 : vector<8x50xf32>
    %cst_44 = arith.constant 0.000000e+00 : f32
    %89 = vector.broadcast %cst_44 : f32 to vector<8x50xf32>
    %90 = arith.maximumf %88, %89 : vector<8x50xf32>
    %91 = arith.truncf %90 : vector<8x50xf32> to vector<8x50xbf16>
    %c0_45 = arith.constant 0 : index
    %c0_46 = arith.constant 0 : index
    %92 = vector.load %arg8[%c0_45, %c0_46] : memref<50x128xbf16, #tpu.memory_space<vmem>>, vector<50x128xbf16>
    %cst_47 = arith.constant dense<0.000000e+00> : vector<8x128xf32>
    %93 = tpu.matmul %91, %92, %cst_47 {dimension_numbers = #tpu.dot_dimension_numbers<[1], [0], [0], [1], [0, 0, 1, 1], [], []>} : vector<8x50xbf16>, vector<50x128xbf16>, vector<8x128xf32> -> vector<8x128xf32>
    %c0_48 = arith.constant 0 : index
    %c0_49 = arith.constant 0 : index
    %94 = vector.load %arg9[%c0_48, %c0_49] : memref<1x128xf32, #tpu.memory_space<vmem>>, vector<1x128xf32>
    %95 = vector.broadcast %94 : vector<1x128xf32> to vector<8x128xf32>
    %96 = arith.addf %93, %95 : vector<8x128xf32>
    %cst_50 = arith.constant dense<0xFF800000> : vector<8xf32>
    %97 = vector.multi_reduction <maximumf>, %96, %cst_50 [1] : vector<8x128xf32> to vector<8xf32>
    %98 = vector.shape_cast %97 : vector<8xf32> to vector<8x1xf32>
    %99 = vector.broadcast %98 : vector<8x1xf32> to vector<8x128xf32>
    %100 = arith.subf %96, %99 : vector<8x128xf32>
    %101 = math.exp %100 : vector<8x128xf32>
    %cst_51 = arith.constant dense<0.000000e+00> : vector<8xf32>
    %102 = vector.multi_reduction <add>, %101, %cst_51 [1] : vector<8x128xf32> to vector<8xf32>
    %103 = vector.shape_cast %102 : vector<8xf32> to vector<8x1xf32>
    %104 = math.log %103 : vector<8x1xf32>
    %105 = vector.broadcast %104 : vector<8x1xf32> to vector<8x128xf32>
    %106 = arith.subf %100, %105 : vector<8x128xf32>
    %c0_52 = arith.constant 0 : index
    %c0_53 = arith.constant 0 : index
    %107 = vector.load %arg10[%c0_52, %c0_53] : memref<8x128xf32, #tpu.memory_space<vmem>>, vector<8x128xf32>
    tpu.vector_store %arg10[%c0_52, %c0_53], %106 {strides = array<i32>} : memref<8x128xf32, #tpu.memory_space<vmem>>, vector<8x128xf32>,
    return
  }
  func.func @transform_0(%arg0: i32) -> (i32, i32, i32) {
    %c0_i32 = arith.constant 0 : i32
    %c0_i32_0 = arith.constant 0 : i32
    %c0_i32_1 = arith.constant 0 : i32
    return %c0_i32, %arg0, %c0_i32_0 : i32, i32, i32
  }
  func.func @transform_1(%arg0: i32) -> (i32, i32) {
    %c0_i32 = arith.constant 0 : i32
    %c0_i32_0 = arith.constant 0 : i32
    %c0_i32_1 = arith.constant 0 : i32
    return %c0_i32, %c0_i32_0 : i32, i32
  }
  func.func @transform_2(%arg0: i32) -> (i32, i32) {
    %c0_i32 = arith.constant 0 : i32
    %c0_i32_0 = arith.constant 0 : i32
    %c0_i32_1 = arith.constant 0 : i32
    return %c0_i32, %c0_i32_0 : i32, i32
  }
  func.func @transform_3(%arg0: i32) -> (i32, i32, i32) {
    %c0_i32 = arith.constant 0 : i32
    %c0_i32_0 = arith.constant 0 : i32
    %c0_i32_1 = arith.constant 0 : i32
    %c0_i32_2 = arith.constant 0 : i32
    return %c0_i32, %c0_i32_0, %c0_i32_1 : i32, i32, i32
  }
  func.func @transform_4(%arg0: i32) -> (i32, i32) {
    %c0_i32 = arith.constant 0 : i32
    %c0_i32_0 = arith.constant 0 : i32
    %c0_i32_1 = arith.constant 0 : i32
    return %c0_i32, %c0_i32_0 : i32, i32
  }
  func.func @transform_5(%arg0: i32) -> (i32, i32, i32) {
    %c0_i32 = arith.constant 0 : i32
    %c0_i32_0 = arith.constant 0 : i32
    %c0_i32_1 = arith.constant 0 : i32
    %c0_i32_2 = arith.constant 0 : i32
    return %c0_i32, %c0_i32_0, %c0_i32_1 : i32, i32, i32
  }
  func.func @transform_6(%arg0: i32) -> (i32, i32) {
    %c0_i32 = arith.constant 0 : i32
    %c0_i32_0 = arith.constant 0 : i32
    %c0_i32_1 = arith.constant 0 : i32
    return %c0_i32, %c0_i32_0 : i32, i32
  }
  func.func @transform_7(%arg0: i32) -> (i32, i32) {
    %c0_i32 = arith.constant 0 : i32
    %c0_i32_0 = arith.constant 0 : i32
    %c0_i32_1 = arith.constant 0 : i32
    return %c0_i32, %c0_i32_0 : i32, i32
  }
  func.func @transform_8(%arg0: i32) -> (i32, i32) {
    %c0_i32 = arith.constant 0 : i32
    %c0_i32_0 = arith.constant 0 : i32
    %c0_i32_1 = arith.constant 0 : i32
    return %c0_i32, %c0_i32_0 : i32, i32
  }
  func.func @transform_9(%arg0: i32) -> (i32, i32) {
    %c0_i32 = arith.constant 0 : i32
    %c0_i32_0 = arith.constant 0 : i32
    return %arg0, %c0_i32 : i32, i32
  }
}

</mosaic_0001>

<bundles_post_ra>
// kernel: tile.18
= control target key start
LH: loop header
LB: loop body
LE: loop exit
PB: predicated region body
PF: predicated region fallthrough
CT: control target
= control target key end

     0   :  { %s22_s0 = inlined_call_operand.vmem [shape: f32[20], index: 0, kind: input, shape index: {}]   ;;  %s23_s1 = inlined_call_operand.vmem [shape: f32[4,20], index: 1, kind: output, shape index: {}]  }
   0x1   :  { %v4_v0 = vld [vmem:[%s22_s0] ss:$0 sm:$0xff] }
   0x2   :  { %5 = vst [vmem:[%s23_s1] sm:$0xf] %v4_v0 }

// kernel: tile.19
= control target key start
LH: loop header
LB: loop body
LE: loop exit
PB: predicated region body
PF: predicated region fallthrough
CT: control target
= control target key end

     0   :  { %vm7_vm0 = vcmask 162816   ;;  %s37_s8 = smov 20   ;;  %s38_s9 = smov 40   ;;  %vm13_vm1 = vcmask 654816   ;;  %vm19_vm2 = vcmask 490816   ;;  %vm25_vm3 = vcmask 326816   ;;  %s55_s0 = inlined_call_operand.vmem [shape: f32[4,20], index: 0, kind: input, shape index: {}]   ;;  %s56_s1 = inlined_call_operand.vmem [shape: f32[80], index: 1, kind: output, shape index: {}]  }
   0x1   :  { %v4_v0 = vld [vmem:[%s55_s0] sm:$0xf]  ;;  %s36_s0 = smov 60  }
   0x2   :  { %5 = vst [vmem:[#allocation1] sm:$0xf] %v4_v0 }
   0x9   :  { %v10_v1 = vld [vmem:[#allocation1 + $0x3] sm:$0x1]   ;;  %v22_v2 = vld [vmem:[#allocation1 + $0x1] sm:$0x1]   ;;  %v6_v3 = vld [vmem:[#allocation1] sm:$0x1]  }
   0xa   :  { %11 = vrot.lane.b32.xlu0 %v10_v1, %s36_s0  ;;  %23 = vrot.lane.b32.xlu1 %v22_v2, %s37_s8  ;;  %v16_v4 = vld [vmem:[#allocation1 + $0x2] sm:$0x1]   ;;  %8 = vst.msk [vmem:[#allocation0] sm:$0x1] %vm7_vm0, %v6_v3  }
   0xe   :  { %17 = vrot.lane.b32.xlu0 %v16_v4, %s38_s9 }
  0x7c   :  { %v12_v5 = vpop.permute.xlu0 %11   ;;  %v24_v6 = vpop.permute.xlu1 %23  }
  0x7d   :  { %14 = vst.msk [vmem:[#allocation0] sm:$0x1] %vm13_vm1, %v12_v5  }
  0x80   :  { %v18_v7 = vpop.permute.xlu0 %17  }
  0x81   :  { %20 = vst.msk [vmem:[#allocation0] sm:$0x1] %vm19_vm2, %v18_v7  }
  0x82   :  { %26 = vst.msk [vmem:[#allocation0] sm:$0x1] %vm25_vm3, %v24_v6  }
  0x89   :  { %v30_v8 = vld [vmem:[#allocation0] sm:$0x1] }
  0x8a   :  { %32 = vst [vmem:[%s56_s1] sm:$0x1] %v30_v8 }

// kernel: tile.13
= control target key start
LH: loop header
LB: loop body
LE: loop exit
PB: predicated region body
PF: predicated region fallthrough
CT: control target
= control target key end

     0   :  { %s28_s0 = inlined_call_operand.vmem [shape: f32[10], index: 0, kind: input, shape index: {}]   ;;  %s29_s1 = inlined_call_operand.vmem [shape: f32[12,10], index: 1, kind: output, shape index: {}]  }
   0x1   :  { %v4_v0 = vld [vmem:[%s28_s0] ss:$0 sm:$0xff] }
   0x2   :  { %5 = vst [vmem:[%s29_s1] sm:$0xff] %v4_v0  ;;  %8 = vst [vmem:[%s29_s1 + $0x8] sm:$0xff] %v4_v0 }

// kernel: tile.14
= control target key start
LH: loop header
LB: loop body
LE: loop exit
PB: predicated region body
PF: predicated region fallthrough
CT: control target
= control target key end

     0   :  { %s99_s10 = smov 110   ;;  %s100_s11 = smov 90   ;;  %vm3_vm0 = vcmask 80896   ;;  %vm9_vm1 = vcmask 982896   ;;  %vm15_vm2 = vcmask 900896   ;;  %vm21_vm3 = vcmask 818896   ;;  %s159_s0 = inlined_call_operand.vmem [shape: f32[12,10], index: 0, kind: input, shape index: {}]   ;;  %s160_s1 = inlined_call_operand.vmem [shape: f32[120], index: 1, kind: output, shape index: {}]  }
   0x1   :  { %v77_v0 = vld [vmem:[%s159_s0 + $0xb] sm:$0x1]   ;;  %v79_v1 = vld [vmem:[%s159_s0 + $0x9] sm:$0x1]   ;;  %v78_v2 = vld [vmem:[%s159_s0 + $0xa] sm:$0x1]  }
   0x2   :  { %7 = vrot.lane.b32.xlu0 %v77_v0, %s99_s10  ;;  %19 = vrot.lane.b32.xlu1 %v79_v1, %s100_s11  ;;  %v80_v3 = vld [vmem:[%s159_s0 + $0x8] sm:$0x1]   ;;  %s101_s16 = smov 100   ;;  %s102_s17 = smov 80   ;;  %v81_v4 = vld [vmem:[%s159_s0 + $0x7] sm:$0x1]  }
   0x3   :  { %v2_v5 = vld [vmem:[%s159_s0] sm:$0x1]   ;;  %v82_v6 = vld [vmem:[%s159_s0 + $0x6] sm:$0x1]   ;;  %s103_s24 = smov 70   ;;  %s104_s25 = smov 60  }
   0x4   :  { %4 = vst.msk [vmem:[#allocation0] sm:$0x1] %vm3_vm0, %v2_v5   ;;  %v83_v7 = vld [vmem:[%s159_s0 + $0x5] sm:$0x1]   ;;  %v84_v8 = vld [vmem:[%s159_s0 + $0x4] sm:$0x1]  }
   0x5   :  { %s105_s30 = smov 50   ;;  %s106_s2 = smov 40   ;;  %v85_v9 = vld [vmem:[%s159_s0 + $0x3] sm:$0x1]   ;;  %v86_v10 = vld [vmem:[%s159_s0 + $0x2] sm:$0x1]  }
   0x6   :  { %13 = vrot.lane.b32.xlu0 %v78_v2, %s101_s16  ;;  %25 = vrot.lane.b32.xlu1 %v80_v3, %s102_s17  ;;  %s107_s7 = smov 30   ;;  %s108_s8 = smov 20   ;;  %v87_v11 = vld [vmem:[%s159_s0 + $0x1] sm:$0x1]   ;;  %vm27_vm4 = vcmask 736896   ;;  %vm33_vm5 = vcmask 654896  }
   0x7   :  { %s109_s0 = smov 10   ;;  %vm39_vm6 = vcmask 572896   ;;  %vm45_vm7 = vcmask 490896   ;;  %vm51_vm8 = vcmask 408896   ;;  %vm57_vm9 = vcmask 326896  }
   0x8   :  { %vm63_vm10 = vcmask 244896   ;;  %vm69_vm11 = vcmask 162896  }
   0xa   :  { %31 = vrot.lane.b32.xlu0 %v81_v4, %s103_s24  ;;  %37 = vrot.lane.b32.xlu1 %v82_v6, %s104_s25 }
   0xe   :  { %43 = vrot.lane.b32.xlu0 %v83_v7, %s105_s30  ;;  %49 = vrot.lane.b32.xlu1 %v84_v8, %s106_s2 }
  0x12   :  { %55 = vrot.lane.b32.xlu0 %v85_v9, %s107_s7  ;;  %61 = vrot.lane.b32.xlu1 %v86_v10, %s108_s8 }
  0x16   :  { %67 = vrot.lane.b32.xlu0 %v87_v11, %s109_s0 }
  0x74   :  { %v8_v12 = vpop.permute.xlu0 %7   ;;  %v20_v13 = vpop.permute.xlu1 %19  }
  0x75   :  { %10 = vst.msk [vmem:[#allocation0] sm:$0x1] %vm9_vm1, %v8_v12  }
  0x78   :  { %v14_v14 = vpop.permute.xlu0 %13   ;;  %v26_v15 = vpop.permute.xlu1 %25  }
  0x79   :  { %16 = vst.msk [vmem:[#allocation0] sm:$0x1] %vm15_vm2, %v14_v14  }
  0x7a   :  { %22 = vst.msk [vmem:[#allocation0] sm:$0x1] %vm21_vm3, %v20_v13  }
  0x7b   :  { %28 = vst.msk [vmem:[#allocation0] sm:$0x1] %vm27_vm4, %v26_v15  }
  0x7c   :  { %v32_v16 = vpop.permute.xlu0 %31   ;;  %v38_v17 = vpop.permute.xlu1 %37  }
  0x7d   :  { %34 = vst.msk [vmem:[#allocation0] sm:$0x1] %vm33_vm5, %v32_v16  }
  0x7e   :  { %40 = vst.msk [vmem:[#allocation0] sm:$0x1] %vm39_vm6, %v38_v17  }
  0x80   :  { %v44_v18 = vpop.permute.xlu0 %43   ;;  %v50_v19 = vpop.permute.xlu1 %49  }
  0x81   :  { %46 = vst.msk [vmem:[#allocation0] sm:$0x1] %vm45_vm7, %v44_v18  }
  0x82   :  { %52 = vst.msk [vmem:[#allocation0] sm:$0x1] %vm51_vm8, %v50_v19  }
  0x84   :  { %v56_v20 = vpop.permute.xlu0 %55   ;;  %v62_v21 = vpop.permute.xlu1 %61  }
  0x85   :  { %58 = vst.msk [vmem:[#allocation0] sm:$0x1] %vm57_vm9, %v56_v20  }
  0x86   :  { %64 = vst.msk [vmem:[#allocation0] sm:$0x1] %vm63_vm10, %v62_v21  }
  0x88   :  { %v68_v22 = vpop.permute.xlu0 %67  }
  0x89   :  { %70 = vst.msk [vmem:[#allocation0] sm:$0x1] %vm69_vm11, %v68_v22  }
  0x90   :  { %v74_v23 = vld [vmem:[#allocation0] sm:$0x1] }
  0x91   :  { %76 = vst [vmem:[%s160_s1] sm:$0x1] %v74_v23 }

// kernel: net_forward.1
= control target key start
LH: loop header
LB: loop body
LE: loop exit
PB: predicated region body
PF: predicated region fallthrough
CT: control target
= control target key end

     0   :  { %vm271_vm0 = vcmask 97280   ;;  %vm308_vm1 = vcmask 1045504   ;;  %v2799_v59 = vmov 0   ;;  %vm2801_vm2 = vmmov 0   ;;  %s3502_s1 = inlined_call_operand.vmem [shape: bf16[140,256], index: 1, kind: input, shape index: {}]   ;;  %s3503_s0 = inlined_call_operand.vmem [shape: bf16[24,8,140], index: 0, kind: input, shape index: {}]   ;;  %s3504_s3 = inlined_call_operand.vmem [shape: bf16[5,128,256], index: 3, kind: input, shape index: {}]   ;;  %s3505_s2 = inlined_call_operand.vmem [shape: f32[1,128], index: 2, kind: input, shape index: {}]   ;;  %s3506_s5 = inlined_call_operand.vmem [shape: bf16[4,128,50], index: 5, kind: input, shape index: {}]   ;;  %s3507_s4 = inlined_call_operand.vmem [shape: f32[1,128], index: 4, kind: input, shape index: {}]   ;;  %s3508_s7 = inlined_call_operand.vmem [shape: bf16[50,128], index: 7, kind: input, shape index: {}]   ;;  %s3509_s6 = inlined_call_operand.vmem [shape: f32[1,50], index: 6, kind: input, shape index: {}]   ;;  %s3510_s8 = inlined_call_operand.vmem [shape: f32[1,128], index: 8, kind: input, shape index: {}]   ;;  %s3511_s9 = inlined_call_operand.vmem [shape: f32[8,128], index: 9, kind: output, shape index: {}]  }
   0x1   :  { %v2576_v0 = vld [vmem:[%s3502_s1 + $0x4] ss:$8 sps:$4 sm:$0xff]   ;;  %v2578_v1 = vld [vmem:[%s3502_s1] ss:$8 sps:$4 sm:$0xff]   ;;  %v2579_v2 = vld [vmem:[%s3502_s1 + $0x14] ss:$8 sps:$4 sm:$0xff]   ;;  %728 = vmatprep.mubr.bf16.mxu1 %v2799_v59 }
   0x2   :  { %315 = vmatprep.subr.bf16.mxu0 %v2576_v0  ;;  %v2581_v3 = vld [vmem:[%s3502_s1 + $0x10] ss:$8 sps:$4 sm:$0xff]   ;;  %v2582_v4 = vld [vmem:[%s3502_s1 + $0x24] ss:$8 sps:$4 sm:$0xff]   ;;  %v2584_v5 = vld [vmem:[%s3502_s1 + $0x20] ss:$8 sps:$4 sm:$0xff]  }
   0x3   :  { %316 = vmatpush1.bf16.msra.mxu0 %v2578_v1  ;;  %v2585_v6 = vld [vmem:[%s3502_s1 + $0x34] ss:$8 sps:$4 sm:$0xff]   ;;  %v2587_v7 = vld [vmem:[%s3502_s1 + $0x30] ss:$8 sps:$4 sm:$0xff]   ;;  %v2588_v8 = vld [vmem:[%s3502_s1 + $0x44] ss:$8 sps:$4 sm:$0xff]  }
   0x4   :  { %317 = vmatprep.subr.bf16.mxu0 %v2579_v2  ;;  %v2605_v9 = vld [vmem:[%s3503_s0 + $0x4] ss:$8 sps:$4 sm:$0xff]   ;;  %v2590_v10 = vld [vmem:[%s3502_s1 + $0x40] ss:$8 sps:$4 sm:$0xff]   ;;  %v2591_v11 = vld [vmem:[%s3502_s1 + $0x54] ss:$8 sps:$4 sm:$0xff]  }
   0x5   :  { %2109 = vmatprep.mubr.msk.bf16.mxu0 %vm271_vm0, %v2605_v9  ;;  %v2593_v12 = vld [vmem:[%s3502_s1 + $0x50] ss:$8 sps:$4 sm:$0xff]   ;;  %v2594_v13 = vld [vmem:[%s3502_s1 + $0x64] ss:$8 sps:$4 sm:$0xff]   ;;  %v2596_v14 = vld [vmem:[%s3502_s1 + $0x60] ss:$8 sps:$4 sm:$0xff]  }
   0x6   :  { %v2597_v15 = vld [vmem:[%s3502_s1 + $0x74] ss:$8 sps:$4 sm:$0xff]   ;;  %v2600_v16 = vld [vmem:[%s3502_s1 + $0x84] ss:$8 sps:$4 sm:$0x3f]   ;;  %vm2007_vm3 = vcmask 1040384  }
   0x7   :  { %318 = vmatpush1.bf16.msra.mxu0 %v2581_v3  ;;  %v2599_v17 = vld [vmem:[%s3502_s1 + $0x70] ss:$8 sps:$4 sm:$0xff]   ;;  %v2602_v18 = vld [vmem:[%s3502_s1 + $0x80] ss:$8 sps:$4 sm:$0x3f]   ;;  %vm2003_vm4 = vcmask 408576  }
   0x8   :  { %319 = vmatprep.subr.bf16.mxu0 %v2582_v4  ;;  %v2639_v19 = vld [vmem:[%s3504_s3 + $0x84] ss:$8 sps:$4 sm:$0xff]   ;;  %v2641_v20 = vld [vmem:[%s3504_s3 + $0x80] ss:$8 sps:$4 sm:$0xff]   ;;  %v310_v21 = vsel %vm308_vm1, %v2602_v18, 0 }
   0x9   :  { %696 = vmatprep.subr.bf16.mxu1 %v2639_v19  ;;  %v2603_v22 = vld [vmem:[%s3503_s0] ss:$8 sps:$4 sm:$0xff]   ;;  %v2606_v23 = vld [vmem:[%s3503_s0 + $0x14] ss:$8 sps:$4 sm:$0xff]   ;;  %v2608_v24 = vld [vmem:[%s3503_s0 + $0x10] ss:$8 sps:$4 sm:$0xff]  }
   0xa   :  { %697 = vmatpush1.bf16.msra.mxu1 %v2641_v20  ;;  %v2609_v25 = vld [vmem:[%s3503_s0 + $0x24] ss:$8 sps:$4 sm:$0xff]   ;;  %v2611_v26 = vld [vmem:[%s3503_s0 + $0x20] ss:$8 sps:$4 sm:$0xff]   ;;  %v2612_v27 = vld [vmem:[%s3503_s0 + $0x34] ss:$8 sps:$4 sm:$0xff]  }
   0xb   :  { %320 = vmatpush1.bf16.msra.mxu0 %v2584_v5  ;;  %v2614_v28 = vld [vmem:[%s3503_s0 + $0x30] ss:$8 sps:$4 sm:$0xff]   ;;  %v2615_v29 = vld [vmem:[%s3503_s0 + $0x44] ss:$8 sps:$4 sm:$0xff]   ;;  %v2617_v30 = vld [vmem:[%s3503_s0 + $0x40] ss:$8 sps:$4 sm:$0xff]  }
   0xc   :  { %321 = vmatprep.subr.bf16.mxu0 %v2585_v6  ;;  %v2618_v31 = vld [vmem:[%s3503_s0 + $0x54] ss:$8 sps:$4 sm:$0xff]   ;;  %v2620_v32 = vld [vmem:[%s3503_s0 + $0x50] ss:$8 sps:$4 sm:$0xff]   ;;  %v2621_v33 = vld [vmem:[%s3503_s0 + $0x64] ss:$8 sps:$4 sm:$0xff]  }
   0xd   :  { %v2623_v34 = vld [vmem:[%s3503_s0 + $0x60] ss:$8 sps:$4 sm:$0xff]   ;;  %v2624_v35 = vld [vmem:[%s3503_s0 + $0x74] ss:$8 sps:$4 sm:$0xff]   ;;  %v2626_v36 = vld [vmem:[%s3503_s0 + $0x70] ss:$8 sps:$4 sm:$0xff]  }
   0xe   :  { %v2627_v37 = vld [vmem:[%s3503_s0 + $0x84] ss:$8 sps:$4 sm:$0xff]   ;;  %v2629_v38 = vld [vmem:[%s3503_s0 + $0x80] ss:$8 sps:$4 sm:$0xff]   ;;  %v2630_v39 = vld [vmem:[%s3503_s0 + $0x94] ss:$8 sps:$4 sm:$0xff]  }
   0xf   :  { %322 = vmatpush1.bf16.msra.mxu0 %v2587_v7  ;;  %v2632_v40 = vld [vmem:[%s3503_s0 + $0x90] ss:$8 sps:$4 sm:$0xff]   ;;  %v2633_v41 = vld [vmem:[%s3503_s0 + $0xa4] ss:$8 sps:$4 sm:$0xff]   ;;  %v2635_v42 = vld [vmem:[%s3503_s0 + $0xa0] ss:$8 sps:$4 sm:$0xff]  }
  0x10   :  { %323 = vmatprep.subr.bf16.mxu0 %v2588_v8  ;;  %v2636_v43 = vld [vmem:[%s3503_s0 + $0xb4] ss:$8 sps:$4 sm:$0xff]   ;;  %v2638_v45 = vld [vmem:[%s3503_s0 + $0xb0] ss:$8 sps:$4 sm:$0xff]   ;;  %v2645_v47 = vld [vmem:[%s3504_s3 + $0xa4] ss:$8 sps:$4 sm:$0xff]  }
  0x11   :  { %v2642_v44 = vld [vmem:[%s3504_s3 + $0x94] ss:$8 sps:$4 sm:$0xff]   ;;  %v2644_v46 = vld [vmem:[%s3504_s3 + $0x90] ss:$8 sps:$4 sm:$0xff]   ;;  %v2647_v48 = vld [vmem:[%s3504_s3 + $0xa0] ss:$8 sps:$4 sm:$0xff]  }
  0x12   :  { %698 = vmatprep.subr.bf16.mxu1 %v2642_v44  ;;  %v2648_v49 = vld [vmem:[%s3504_s3 + $0xb4] ss:$8 sps:$4 sm:$0xff]   ;;  %v2650_v50 = vld [vmem:[%s3504_s3 + $0xb0] ss:$8 sps:$4 sm:$0xff]   ;;  %v2651_v51 = vld [vmem:[%s3504_s3 + $0xc4] ss:$8 sps:$4 sm:$0xff]  }
  0x13   :  { %324 = vmatpush1.bf16.msra.mxu0 %v2590_v10  ;;  %699 = vmatpush1.bf16.msra.mxu1 %v2644_v46  ;;  %v2653_v52 = vld [vmem:[%s3504_s3 + $0xc0] ss:$8 sps:$4 sm:$0xff]   ;;  %v2654_v53 = vld [vmem:[%s3504_s3 + $0xd4] ss:$8 sps:$4 sm:$0xff]   ;;  %v2656_v54 = vld [vmem:[%s3504_s3 + $0xd0] ss:$8 sps:$4 sm:$0xff]  }
  0x14   :  { %325 = vmatprep.subr.bf16.mxu0 %v2591_v11  ;;  %700 = vmatprep.subr.bf16.mxu1 %v2645_v47  ;;  %v2657_v55 = vld [vmem:[%s3504_s3 + $0xe4] ss:$8 sps:$4 sm:$0xff]   ;;  %v2659_v56 = vld [vmem:[%s3504_s3 + $0xe0] ss:$8 sps:$4 sm:$0xff]   ;;  %v2660_v57 = vld [vmem:[%s3504_s3 + $0xf4] ss:$8 sps:$4 sm:$0xff]  }
  0x15   :  { %v2662_v58 = vld [vmem:[%s3504_s3 + $0xf0] ss:$8 sps:$4 sm:$0xff]   ;;  %v2665_v60 = vld [vmem:[%s3504_s3 + $0x4] ss:$8 sps:$4 sm:$0xff]   ;;  %v3045_v1 = vld [vmem:[%s3505_s2] ss:$0 sm:$0xff] }
  0x17   :  { %326 = vmatpush1.bf16.msra.mxu0 %v2593_v12  ;;  %701 = vmatpush1.bf16.msra.mxu1 %v2647_v48 }
  0x18   :  { %327 = vmatprep.subr.bf16.mxu0 %v2594_v13  ;;  %702 = vmatprep.subr.bf16.mxu1 %v2648_v49  ;;  %v2669_v49 = vld [vmem:[%s3504_s3 + $0x20] ss:$8 sps:$4 sm:$0xff]  }
  0x1b   :  { %328 = vmatpush1.bf16.msra.mxu0 %v2596_v14  ;;  %703 = vmatpush1.bf16.msra.mxu1 %v2650_v50 }
  0x1c   :  { %329 = vmatprep.subr.bf16.mxu0 %v2597_v15  ;;  %704 = vmatprep.subr.bf16.mxu1 %v2651_v51  ;;  %v2674_v51 = vld [vmem:[%s3504_s3 + $0x34] ss:$8 sps:$4 sm:$0xff]  }
  0x1f   :  { %330 = vmatpush1.bf16.msra.mxu0 %v2599_v17  ;;  %705 = vmatpush1.bf16.msra.mxu1 %v2653_v52 }
  0x20   :  { %2108 = vmatprep.subr.msk.bf16.mxu0 %vm308_vm1, %v2600_v16  ;;  %706 = vmatprep.subr.bf16.mxu1 %v2654_v53 }
  0x23   :  { %332 = vmatpush1.bf16.msra.mxu0 %v310_v21  ;;  %707 = vmatpush1.bf16.msra.mxu1 %v2656_v54 }
  0x24   :  { %708 = vmatprep.subr.bf16.mxu1 %v2657_v55  ;;  %v2672_v55 = vld [vmem:[%s3504_s3 + $0x30] ss:$8 sps:$4 sm:$0xff]  }
  0x26   :  { %348 = vmatmul.mubr.bf16.vlgmr.msra.gmra.mrb[0].mxu0 %v2603_v22 }
  0x27   :  { %2110 = vmatprep.mubr.msk.bf16.mxu0 %vm271_vm0, %v2606_v23  ;;  %709 = vmatpush1.bf16.msra.mxu1 %v2659_v56 }
  0x28   :  { %710 = vmatprep.subr.bf16.mxu1 %v2660_v57 }
  0x2b   :  { %711 = vmatpush1.bf16.msra.mxu1 %v2662_v58  ;;  %v2677_v58 = vld [vmem:[%s3504_s3 + $0x44] ss:$8 sps:$4 sm:$0xff]  }
  0x2c   :  { %859 = vmatprep.subr.bf16.mxu1 %v2665_v60 }
  0x2e   :  { %358 = vmatmul.mubr.bf16.gmra.mrb[4].mxu0 %v2608_v24 }
  0x2f   :  { %2111 = vmatprep.mubr.msk.bf16.mxu0 %vm271_vm0, %v2609_v25 }
  0x36   :  { %368 = vmatmul.mubr.bf16.gmra.mrb[8].mxu0 %v2611_v26 }
  0x37   :  { %2112 = vmatprep.mubr.msk.bf16.mxu0 %vm271_vm0, %v2612_v27 }
  0x3e   :  { %378 = vmatmul.mubr.bf16.gmra.mrb[12].mxu0 %v2614_v28 }
  0x3f   :  { %2113 = vmatprep.mubr.msk.bf16.mxu0 %vm271_vm0, %v2615_v29 }
  0x46   :  { %388 = vmatmul.mubr.bf16.gmra.mrb[16].mxu0 %v2617_v30 }
  0x47   :  { %2114 = vmatprep.mubr.msk.bf16.mxu0 %vm271_vm0, %v2618_v31 }
  0x4e   :  { %398 = vmatmul.mubr.bf16.gmra.mrb[20].mxu0 %v2620_v32 }
  0x4f   :  { %2115 = vmatprep.mubr.msk.bf16.mxu0 %vm271_vm0, %v2621_v33 }
  0x56   :  { %408 = vmatmul.mubr.bf16.gmra.mrb[24].mxu0 %v2623_v34  ;;  %v2663_v34 = vld [vmem:[%s3504_s3] ss:$8 sps:$4 sm:$0xff]  }
  0x57   :  { %2116 = vmatprep.mubr.msk.bf16.mxu0 %vm271_vm0, %v2624_v35 }
  0x5e   :  { %418 = vmatmul.mubr.bf16.gmra.mrb[28].mxu0 %v2626_v36 }
  0x5f   :  { %2117 = vmatprep.mubr.msk.bf16.mxu0 %vm271_vm0, %v2627_v37  ;;  %v2668_v37 = vld [vmem:[%s3504_s3 + $0x14] ss:$8 sps:$4 sm:$0xff]  }
  0x66   :  { %428 = vmatmul.mubr.bf16.gmra.mrb[32].mxu0 %v2629_v38 }
  0x67   :  { %2118 = vmatprep.mubr.msk.bf16.mxu0 %vm271_vm0, %v2630_v39 }
  0x6e   :  { %438 = vmatmul.mubr.bf16.gmra.mrb[36].mxu0 %v2632_v40  ;;  %v2666_v40 = vld [vmem:[%s3504_s3 + $0x10] ss:$8 sps:$4 sm:$0xff]  }
  0x6f   :  { %2119 = vmatprep.mubr.msk.bf16.mxu0 %vm271_vm0, %v2633_v41 }
  0x76   :  { %448 = vmatmul.mubr.bf16.gmra.mrb[40].mxu0 %v2635_v42 }
  0x77   :  { %2120 = vmatprep.mubr.msk.bf16.mxu0 %vm271_vm0, %v2636_v43  ;;  %v2671_v43 = vld [vmem:[%s3504_s3 + $0x24] ss:$8 sps:$4 sm:$0xff]  }
  0x7e   :  { %458 = vmatmul.mubr.bf16.gmra.mrb[44].mxu0 %v2638_v45 }
  0xf9   :  { %v349_v61 = vpop.f32.mrb[0].mxu0 }
  0xfa   :  { %v351_v62 = vpop.f32.mrb[1].mxu0 }
  0xfb   :  { %v468_v63 = vmax.f32 %v349_v61, %v351_v62  ;;  %v353_v0 = vpop.f32.mrb[2].mxu0 }
  0xfc   :  { %v355_v2 = vpop.f32.mrb[3].mxu0 }
  0xfd   :  { %v469_v3 = vmax.f32 %v353_v0, %v355_v2  ;;  %v499_v4 = vadd.f32 %v3045_v1, %v468_v63  ;;  %v2675_v2 = vld [vmem:[%s3504_s3 + $0x40] ss:$8 sps:$4 sm:$0xff]  }
  0xff   :  { %v500_v5 = vadd.f32 %v3045_v1, %v469_v3 }
 0x101   :  { %v523_v6 = vmax.f32 %v499_v4, %v500_v5  ;;  %v359_v7 = vpop.f32.mrb[4].mxu0  ;;  %v2680_v5 = vld [vmem:[%s3504_s3 + $0x54] ss:$8 sps:$4 sm:$0xff]  }
 0x102   :  { %v361_v8 = vpop.f32.mrb[5].mxu0 }
 0x103   :  { %v470_v9 = vmax.f32 %v359_v7, %v361_v8  ;;  %v363_v10 = vpop.f32.mrb[6].mxu0  ;;  %v3051_v18 = vmax.f32 %v523_v6, 0.0  ;;  %v2678_v8 = vld [vmem:[%s3504_s3 + $0x50] ss:$8 sps:$4 sm:$0xff]  }
 0x104   :  { %v365_v11 = vpop.f32.mrb[7].mxu0 }
 0x105   :  { %v471_v12 = vmax.f32 %v363_v10, %v365_v11  ;;  %v501_v13 = vadd.f32 %v3045_v1, %v470_v9  ;;  %v2683_v11 = vld [vmem:[%s3504_s3 + $0x64] ss:$8 sps:$4 sm:$0xff]  }
 0x107   :  { %v502_v14 = vadd.f32 %v3045_v1, %v471_v12 }
 0x109   :  { %v524_v15 = vmax.f32 %v501_v13, %v502_v14  ;;  %v369_v16 = vpop.f32.mrb[8].mxu0 }
 0x10a   :  { %v371_v17 = vpop.f32.mrb[9].mxu0 }
 0x10b   :  { %v3053_v19 = vmax.f32 %v524_v15, 0.0  ;;  %v472_v20 = vmax.f32 %v369_v16, %v371_v17  ;;  %v373_v21 = vpop.f32.mrb[10].mxu0  ;;  %v2681_v17 = vld [vmem:[%s3504_s3 + $0x60] ss:$8 sps:$4 sm:$0xff]  }
 0x10c   :  { %v375_v22 = vpop.f32.mrb[11].mxu0 }
 0x10d   :  { %v2369_v23 = vpack.c.bf16 %v3053_v19, %v3051_v18  ;;  %v473_v24 = vmax.f32 %v373_v21, %v375_v22  ;;  %v503_v25 = vadd.f32 %v3045_v1, %v472_v20  ;;  %v2686_v21 = vld [vmem:[%s3504_s3 + $0x74] ss:$8 sps:$4 sm:$0xff]   ;;  %v2693_v18 = vld [vmem:[%s3504_s3 + $0x120] ss:$8 sps:$4 sm:$0xff]  }
 0x10f   :  { %v504_v26 = vadd.f32 %v3045_v1, %v473_v24 }
 0x111   :  { %v525_v27 = vmax.f32 %v503_v25, %v504_v26  ;;  %v379_v28 = vpop.f32.mrb[12].mxu0  ;;  %v2684_v26 = vld [vmem:[%s3504_s3 + $0x70] ss:$8 sps:$4 sm:$0xff]  }
 0x112   :  { %v381_v29 = vpop.f32.mrb[13].mxu0 }
 0x113   :  { %v537_v30 = vmax.f32 %v525_v27, 0.0  ;;  %v474_v31 = vmax.f32 %v379_v28, %v381_v29  ;;  %v383_v32 = vpop.f32.mrb[14].mxu0  ;;  %v2689_v29 = vld [vmem:[%s3504_s3 + $0x104] ss:$8 sps:$4 sm:$0xff]  }
 0x114   :  { %v385_v33 = vpop.f32.mrb[15].mxu0 }
 0x115   :  { %v475_v35 = vmax.f32 %v383_v32, %v385_v33  ;;  %v2365_v36 = vpack.c.bf16 %v537_v30, %v3053_v19  ;;  %v505_v38 = vadd.f32 %v3045_v1, %v474_v31 }
 0x117   :  { %v506_v39 = vadd.f32 %v3045_v1, %v475_v35  ;;  %729 = vmatmul.mubr.bf16.vlgmr.msra.gmra.mrb[0].mxu1 %v2365_v36 }
 0x118   :  { %738 = vmatprep.mubr.bf16.mxu1 %v2799_v59  ;;  %860 = vmatpush1.bf16.msra.mxu1 %v2663_v34 }
 0x119   :  { %v526_v41 = vmax.f32 %v505_v38, %v506_v39  ;;  %v389_v42 = vpop.f32.mrb[16].mxu0  ;;  %861 = vmatprep.subr.bf16.mxu1 %v2668_v37 }
 0x11a   :  { %v391_v44 = vpop.f32.mrb[17].mxu0 }
 0x11b   :  { %v538_v45 = vmax.f32 %v526_v41, 0.0  ;;  %v476_v46 = vmax.f32 %v389_v42, %v391_v44  ;;  %v393_v47 = vpop.f32.mrb[18].mxu0 }
 0x11c   :  { %v395_v48 = vpop.f32.mrb[19].mxu0  ;;  %862 = vmatpush1.bf16.msra.mxu1 %v2666_v40 }
 0x11d   :  { %v477_v50 = vmax.f32 %v393_v47, %v395_v48  ;;  %863 = vmatprep.subr.bf16.mxu1 %v2671_v43  ;;  %v3081_v52 = vpack.c.bf16 %v538_v45, %v537_v30  ;;  %v507_v53 = vadd.f32 %v3045_v1, %v476_v46 }
 0x11f   :  { %v508_v54 = vadd.f32 %v3045_v1, %v477_v50 }
 0x120   :  { %864 = vmatpush1.bf16.msra.mxu1 %v2669_v49 }
 0x121   :  { %v527_v56 = vmax.f32 %v507_v53, %v508_v54  ;;  %v399_v57 = vpop.f32.mrb[20].mxu0  ;;  %865 = vmatprep.subr.bf16.mxu1 %v2674_v51 }
 0x122   :  { %v401_v60 = vpop.f32.mrb[21].mxu0 }
 0x123   :  { %v539_v61 = vmax.f32 %v527_v56, 0.0  ;;  %v478_v62 = vmax.f32 %v399_v57, %v401_v60  ;;  %v403_v63 = vpop.f32.mrb[22].mxu0 }
 0x124   :  { %v405_v0 = vpop.f32.mrb[23].mxu0  ;;  %866 = vmatpush1.bf16.msra.mxu1 %v2672_v55 }
 0x125   :  { %v479_v3 = vmax.f32 %v403_v63, %v405_v0  ;;  %v3094_v4 = vpack.c.bf16 %v539_v61, %v538_v45  ;;  %867 = vmatprep.subr.bf16.mxu1 %v2677_v58  ;;  %v509_v6 = vadd.f32 %v3045_v1, %v478_v62  ;;  %v2800_v63 = vmov 0.0   ;;  %v2759_v0 = vld [vmem:[%s3506_s5 + $0x40] sm:$0xff]  }
 0x126   :  { %2417 = vmatprep.subr.bf16.mxu0 %v2800_v63  ;;  %2433 = vmatprep.mubr.msk.bf16.mxu0 %vm2801_vm2, %v2800_v63 }
 0x127   :  { %v510_v7 = vadd.f32 %v3045_v1, %v479_v3  ;;  %739 = vmatmul.mubr.bf16.gmra.mrb[4].mxu1 %v3094_v4  ;;  %2418 = vmatpush3.bf16.msra.mxu0 %v2759_v0  ;;  %v2728_v0 = vld [vmem:[%s3504_s3 + $0x1d4] ss:$8 sps:$4 sm:$0xff]  }
 0x128   :  { %748 = vmatprep.mubr.bf16.mxu1 %v2799_v59  ;;  %868 = vmatpush1.bf16.msra.mxu1 %v2675_v2 }
 0x129   :  { %v528_v9 = vmax.f32 %v509_v6, %v510_v7  ;;  %v409_v10 = vpop.f32.mrb[24].mxu0  ;;  %869 = vmatprep.subr.bf16.mxu1 %v2680_v5  ;;  %v2687_v5 = vld [vmem:[%s3504_s3 + $0x100] ss:$8 sps:$4 sm:$0xff]   ;;  %2419 = vmatprep.subr.bf16.mxu0 %v2800_v63 }
 0x12a   :  { %v411_v12 = vpop.f32.mrb[25].mxu0  ;;  %v2760_v7 = vld [vmem:[%s3506_s5 + $0x48] sm:$0xff]  }
 0x12b   :  { %v540_v13 = vmax.f32 %v528_v9, 0.0  ;;  %v480_v14 = vmax.f32 %v409_v10, %v411_v12  ;;  %v413_v15 = vpop.f32.mrb[26].mxu0  ;;  %v2692_v12 = vld [vmem:[%s3504_s3 + $0x114] ss:$8 sps:$4 sm:$0xff]   ;;  %2420 = vmatpush3.bf16.msra.mxu0 %v2760_v7  ;;  %v2732_v7 = vld [vmem:[%s3504_s3 + $0x1f0] ss:$8 sps:$4 sm:$0xff]  }
 0x12c   :  { %v415_v16 = vpop.f32.mrb[27].mxu0  ;;  %870 = vmatpush1.bf16.msra.mxu1 %v2678_v8  ;;  %2421 = vmatprep.subr.bf16.mxu0 %v2800_v63 }
 0x12d   :  { %v481_v20 = vmax.f32 %v413_v15, %v415_v16  ;;  %871 = vmatprep.subr.bf16.mxu1 %v2683_v11  ;;  %v3115_v22 = vpack.c.bf16 %v540_v13, %v539_v61  ;;  %v511_v24 = vadd.f32 %v3045_v1, %v480_v14  ;;  %v2761_v16 = vld [vmem:[%s3506_s5 + $0x50] sm:$0xff]  }
 0x12f   :  { %v512_v25 = vadd.f32 %v3045_v1, %v481_v20  ;;  %2422 = vmatpush3.bf16.msra.mxu0 %v2761_v16  ;;  %v2744_v16 = vld [vmem:[%s3504_s3 + $0x230] ss:$8 sps:$4 sm:$0xff]  }
 0x130   :  { %872 = vmatpush1.bf16.msra.mxu1 %v2681_v17  ;;  %v2690_v17 = vld [vmem:[%s3504_s3 + $0x110] ss:$8 sps:$4 sm:$0xff]   ;;  %2423 = vmatprep.subr.bf16.mxu0 %v2800_v63 }
 0x131   :  { %v529_v27 = vmax.f32 %v511_v24, %v512_v25  ;;  %v419_v28 = vpop.f32.mrb[28].mxu0  ;;  %873 = vmatprep.subr.bf16.mxu1 %v2686_v21  ;;  %v2695_v21 = vld [vmem:[%s3504_s3 + $0x124] ss:$8 sps:$4 sm:$0xff]  }
 0x132   :  { %v421_v30 = vpop.f32.mrb[29].mxu0 }
 0x133   :  { %v541_v31 = vmax.f32 %v529_v27, 0.0  ;;  %v482_v32 = vmax.f32 %v419_v28, %v421_v30  ;;  %v423_v33 = vpop.f32.mrb[30].mxu0 }
 0x134   :  { %v425_v34 = vpop.f32.mrb[31].mxu0  ;;  %874 = vmatpush1.bf16.msra.mxu1 %v2684_v26  ;;  %v2698_v26 = vld [vmem:[%s3504_s3 + $0x134] ss:$8 sps:$4 sm:$0xff]  }
 0x135   :  { %v483_v35 = vmax.f32 %v423_v33, %v425_v34  ;;  %v3125_v36 = vpack.c.bf16 %v541_v31, %v540_v13  ;;  %1033 = vmatprep.subr.bf16.mxu1 %v2689_v29  ;;  %v513_v37 = vadd.f32 %v3045_v1, %v482_v32 }
 0x137   :  { %v514_v38 = vadd.f32 %v3045_v1, %v483_v35  ;;  %749 = vmatmul.mubr.bf16.gmra.mrb[8].mxu1 %v3125_v36  ;;  %v2696_v35 = vld [vmem:[%s3504_s3 + $0x130] ss:$8 sps:$4 sm:$0xff]  }
 0x138   :  { %758 = vmatprep.mubr.bf16.mxu1 %v2799_v59 }
 0x139   :  { %v530_v39 = vmax.f32 %v513_v37, %v514_v38  ;;  %v429_v40 = vpop.f32.mrb[32].mxu0  ;;  %v2701_v37 = vld [vmem:[%s3504_s3 + $0x144] ss:$8 sps:$4 sm:$0xff]  }
 0x13a   :  { %v431_v41 = vpop.f32.mrb[33].mxu0 }
 0x13b   :  { %v542_v42 = vmax.f32 %v530_v39, 0.0  ;;  %v484_v43 = vmax.f32 %v429_v40, %v431_v41  ;;  %v433_v44 = vpop.f32.mrb[34].mxu0  ;;  %v2764_v39 = vld [vmem:[%s3506_s5 + $0x68] sm:$0xff]  }
 0x13c   :  { %v435_v45 = vpop.f32.mrb[35].mxu0  ;;  %v2699_v41 = vld [vmem:[%s3504_s3 + $0x140] ss:$8 sps:$4 sm:$0xff]  }
 0x13d   :  { %v485_v46 = vmax.f32 %v433_v44, %v435_v45  ;;  %v3131_v47 = vpack.c.bf16 %v542_v42, %v541_v31  ;;  %v515_v48 = vadd.f32 %v3045_v1, %v484_v43  ;;  %v2763_v31 = vld [vmem:[%s3506_s5 + $0x60] sm:$0xff]   ;;  %v2765_v43 = vld [vmem:[%s3506_s5 + $0x70] sm:$0xff]  }
 0x13e   :  { %v2702_v45 = vld [vmem:[%s3504_s3 + $0x150] ss:$8 sps:$4 sm:$0xff]  }
 0x13f   :  { %v516_v49 = vadd.f32 %v3045_v1, %v485_v46  ;;  %v2707_v46 = vld [vmem:[%s3504_s3 + $0x164] ss:$8 sps:$4 sm:$0xff]  }
 0x141   :  { %v531_v50 = vmax.f32 %v515_v48, %v516_v49  ;;  %v439_v51 = vpop.f32.mrb[36].mxu0  ;;  %v2705_v48 = vld [vmem:[%s3504_s3 + $0x160] ss:$8 sps:$4 sm:$0xff]   ;;  %v2710_v49 = vld [vmem:[%s3504_s3 + $0x174] ss:$8 sps:$4 sm:$0xff]  }
 0x142   :  { %v441_v53 = vpop.f32.mrb[37].mxu0 }
 0x143   :  { %v543_v54 = vmax.f32 %v531_v50, 0.0  ;;  %v486_v55 = vmax.f32 %v439_v51, %v441_v53  ;;  %v443_v56 = vpop.f32.mrb[38].mxu0  ;;  %v2708_v50 = vld [vmem:[%s3504_s3 + $0x170] ss:$8 sps:$4 sm:$0xff]   ;;  %v2713_v51 = vld [vmem:[%s3504_s3 + $0x184] ss:$8 sps:$4 sm:$0xff]  }
 0x144   :  { %v445_v57 = vpop.f32.mrb[39].mxu0  ;;  %v2711_v53 = vld [vmem:[%s3504_s3 + $0x180] ss:$8 sps:$4 sm:$0xff]  }
 0x145   :  { %v517_v58 = vadd.f32 %v3045_v1, %v486_v55  ;;  %v487_v60 = vmax.f32 %v443_v56, %v445_v57  ;;  %v3136_v61 = vpack.c.bf16 %v543_v54, %v542_v42  ;;  %v2714_v55 = vld [vmem:[%s3504_s3 + $0x190] ss:$8 sps:$4 sm:$0xff]   ;;  %v2719_v56 = vld [vmem:[%s3504_s3 + $0x1a4] ss:$8 sps:$4 sm:$0xff]   ;;  %v2717_v57 = vld [vmem:[%s3504_s3 + $0x1a0] ss:$8 sps:$4 sm:$0xff]  }
 0x147   :  { %v518_v62 = vadd.f32 %v3045_v1, %v487_v60  ;;  %759 = vmatmul.mubr.bf16.gmra.mrb[12].mxu1 %v3136_v61  ;;  %v2725_v60 = vld [vmem:[%s3504_s3 + $0x1c4] ss:$8 sps:$4 sm:$0xff]  }
 0x148   :  { %891 = vmatprep.mubr.bf16.mxu1 %v2799_v59 }
 0x149   :  { %v532_v2 = vmax.f32 %v517_v58, %v518_v62  ;;  %v449_v3 = vpop.f32.mrb[40].mxu0  ;;  %v2720_v58 = vld [vmem:[%s3504_s3 + $0x1b0] ss:$8 sps:$4 sm:$0xff]   ;;  %v2723_v62 = vld [vmem:[%s3504_s3 + $0x1c0] ss:$8 sps:$4 sm:$0xff]  }
 0x14a   :  { %v451_v6 = vpop.f32.mrb[41].mxu0 }
 0x14b   :  { %v3151_v8 = vmax.f32 %v532_v2, 0.0  ;;  %v488_v9 = vmax.f32 %v449_v3, %v451_v6  ;;  %v453_v10 = vpop.f32.mrb[42].mxu0  ;;  %v2726_v2 = vld [vmem:[%s3504_s3 + $0x1d0] ss:$8 sps:$4 sm:$0xff]   ;;  %v2731_v3 = vld [vmem:[%s3504_s3 + $0x1e4] ss:$8 sps:$4 sm:$0xff]  }
 0x14c   :  { %v455_v11 = vpop.f32.mrb[43].mxu0  ;;  %v2734_v6 = vld [vmem:[%s3504_s3 + $0x1f4] ss:$8 sps:$4 sm:$0xff]  }
 0x14d   :  { %v519_v13 = vadd.f32 %v3045_v1, %v488_v9  ;;  %v489_v14 = vmax.f32 %v453_v10, %v455_v11  ;;  %v3159_v15 = vpack.c.bf16 %v3151_v8, %v543_v54  ;;  %v2716_v54 = vld [vmem:[%s3504_s3 + $0x194] ss:$8 sps:$4 sm:$0xff]   ;;  %v2737_v9 = vld [vmem:[%s3504_s3 + $0x204] ss:$8 sps:$4 sm:$0xff]   ;;  %v2735_v10 = vld [vmem:[%s3504_s3 + $0x200] ss:$8 sps:$4 sm:$0xff]  }
 0x14e   :  { %v2740_v11 = vld [vmem:[%s3504_s3 + $0x214] ss:$8 sps:$4 sm:$0xff]  }
 0x14f   :  { %892 = vmatmul.mubr.bf16.vlgmr.msra.gmra.mrb[0].mxu1 %v2369_v23  ;;  %v520_v20 = vadd.f32 %v3045_v1, %v489_v14  ;;  %v2762_v23 = vld [vmem:[%s3506_s5 + $0x58] sm:$0xff]   ;;  %v2741_v14 = vld [vmem:[%s3504_s3 + $0x220] ss:$8 sps:$4 sm:$0xff]  }
 0x150   :  { %1034 = vmatpush1.bf16.msra.mxu1 %v2687_v5  ;;  %901 = vmatprep.mubr.bf16.mxu1 %v2799_v59  ;;  %v2729_v5 = vld [vmem:[%s3504_s3 + $0x1e0] ss:$8 sps:$4 sm:$0xff]  }
 0x151   :  { %1035 = vmatprep.subr.bf16.mxu1 %v2692_v12  ;;  %v533_v24 = vmax.f32 %v519_v13, %v520_v20  ;;  %v459_v25 = vpop.f32.mrb[44].mxu0  ;;  %2424 = vmatpush3.bf16.msra.mxu0 %v2762_v23  ;;  %v2738_v12 = vld [vmem:[%s3504_s3 + $0x210] ss:$8 sps:$4 sm:$0xff]   ;;  %v2743_v13 = vld [vmem:[%s3504_s3 + $0x224] ss:$8 sps:$4 sm:$0xff]  }
 0x152   :  { %v461_v19 = vpop.f32.mrb[45].mxu0  ;;  %2425 = vmatprep.subr.bf16.mxu0 %v2800_v63  ;;  %v2747_v20 = vld [vmem:[%s3504_s3 + $0x240] ss:$8 sps:$4 sm:$0xff]  }
 0x153   :  { %v3185_v27 = vmax.f32 %v533_v24, 0.0  ;;  %v490_v28 = vmax.f32 %v459_v25, %v461_v19  ;;  %v463_v29 = vpop.f32.mrb[46].mxu0  ;;  %v2755_v24 = vld [vmem:[%s3504_s3 + $0x264] ss:$8 sps:$4 sm:$0xff]   ;;  %v2753_v25 = vld [vmem:[%s3504_s3 + $0x260] ss:$8 sps:$4 sm:$0xff]  }
 0x154   :  { %1036 = vmatpush1.bf16.msra.mxu1 %v2690_v17  ;;  %v465_v30 = vpop.f32.mrb[47].mxu0  ;;  %v2749_v17 = vld [vmem:[%s3504_s3 + $0x244] ss:$8 sps:$4 sm:$0xff]  }
 0x155   :  { %1037 = vmatprep.subr.bf16.mxu1 %v2695_v21  ;;  %v521_v32 = vadd.f32 %v3045_v1, %v490_v28  ;;  %v491_v33 = vmax.f32 %v463_v29, %v465_v30  ;;  %v2374_v34 = vpack.c.bf16 %v3185_v27, %v3151_v8  ;;  %2426 = vmatpush3.bf16.msra.mxu0 %v2763_v31  ;;  %v2750_v21 = vld [vmem:[%s3504_s3 + $0x250] ss:$8 sps:$4 sm:$0xff]   ;;  %v2766_v19 = vld [vmem:[%s3506_s5 + $0x80] sm:$0xff]   ;;  %v2772_v23 = vld [vmem:[%s3506_s5 + $0xa8] sm:$0xff]  }
 0x156   :  { %2427 = vmatprep.subr.bf16.mxu0 %v2800_v63  ;;  %v2769_v8 = vld [vmem:[%s3506_s5 + $0x78] sm:$0xff]  }
 0x157   :  { %902 = vmatmul.mubr.bf16.gmra.mrb[4].mxu1 %v3081_v52  ;;  %v522_v38 = vadd.f32 %v3045_v1, %v491_v33  ;;  %v2704_v1 = vld [vmem:[%s3504_s3 + $0x154] ss:$8 sps:$4 sm:$0xff]  }
 0x158   :  { %1038 = vmatpush1.bf16.msra.mxu1 %v2693_v18  ;;  %911 = vmatprep.mubr.bf16.mxu1 %v2799_v59  ;;  %v2756_v18 = vld [vmem:[%s3504_s3 + $0x270] ss:$8 sps:$4 sm:$0xff]  }
 0x159   :  { %1039 = vmatprep.subr.bf16.mxu1 %v2698_v26  ;;  %v534_v40 = vmax.f32 %v521_v32, %v522_v38  ;;  %2428 = vmatpush3.bf16.msra.mxu0 %v2764_v39  ;;  %v2774_v26 = vld [vmem:[%s3506_s5 + $0xb0] sm:$0xff]   ;;  %v2277_v32 = vld [vmem:[%s3507_s4] ss:$0 sm:$0xff] }
 0x15a   :  { %2429 = vmatprep.subr.bf16.mxu0 %v2800_v63 }
 0x15b   :  { %v3213_v42 = vmax.f32 %v534_v40, 0.0 }
 0x15c   :  { %1040 = vmatpush1.bf16.msra.mxu1 %v2696_v35 }
 0x15d   :  { %1041 = vmatprep.subr.bf16.mxu1 %v2701_v37  ;;  %v2375_v44 = vpack.c.bf16 %v3213_v42, %v3185_v27  ;;  %2430 = vmatpush3.bf16.msra.mxu0 %v2765_v43  ;;  %v2776_v27 = vld [vmem:[%s3506_s5 + $0xb8] sm:$0xff]  }
 0x15e   :  { %2431 = vmatprep.subr.bf16.mxu0 %v2800_v63 }
 0x15f   :  { %912 = vmatmul.mubr.bf16.gmra.mrb[8].mxu1 %v3115_v22 }
 0x160   :  { %1042 = vmatpush1.bf16.msra.mxu1 %v2699_v41  ;;  %921 = vmatprep.mubr.bf16.mxu1 %v2799_v59 }
 0x161   :  { %1043 = vmatprep.subr.bf16.mxu1 %v2704_v1  ;;  %2432 = vmatpush3.bf16.msra.mxu0 %v2769_v8  ;;  %v2790_v8 = vld [vmem:[%s3506_s5 + $0xf8] sm:$0xff]  }
 0x162   :  { %2437 = vmatprep.subr.bf16.mxu0 %v2800_v63 }
 0x164   :  { %1044 = vmatpush1.bf16.msra.mxu1 %v2702_v45 }
 0x165   :  { %1045 = vmatprep.subr.bf16.mxu1 %v2707_v46 }
 0x167   :  { %922 = vmatmul.mubr.bf16.gmra.mrb[12].mxu1 %v3131_v47 }
 0x168   :  { %1046 = vmatpush1.bf16.msra.mxu1 %v2705_v48  ;;  %1065 = vmatprep.mubr.bf16.mxu1 %v2799_v59 }
 0x169   :  { %1047 = vmatprep.subr.bf16.mxu1 %v2710_v49 }
 0x16c   :  { %1048 = vmatpush1.bf16.msra.mxu1 %v2708_v50 }
 0x16d   :  { %1223 = vmatprep.subr.bf16.mxu1 %v2713_v51 }
 0x16f   :  { %1066 = vmatmul.mubr.bf16.vlgmr.msra.gmra.mrb[0].mxu1 %v3081_v52  ;;  %v2722_v52 = vld [vmem:[%s3504_s3 + $0x1b4] ss:$8 sps:$4 sm:$0xff]  }
 0x170   :  { %1224 = vmatpush1.bf16.msra.mxu1 %v2711_v53  ;;  %1075 = vmatprep.mubr.bf16.mxu1 %v2799_v59 }
 0x171   :  { %1225 = vmatprep.subr.bf16.mxu1 %v2716_v54 }
 0x174   :  { %1226 = vmatpush1.bf16.msra.mxu1 %v2714_v55  ;;  %v2773_v55 = vld [vmem:[%s3506_s5] sm:$0xff]  }
 0x175   :  { %1227 = vmatprep.subr.bf16.mxu1 %v2719_v56 }
 0x177   :  { %1076 = vmatmul.mubr.bf16.gmra.mrb[4].mxu1 %v3115_v22 }
 0x178   :  { %1228 = vmatpush1.bf16.msra.mxu1 %v2717_v57  ;;  %1085 = vmatprep.mubr.bf16.mxu1 %v2799_v59 }
 0x179   :  { %1229 = vmatprep.subr.bf16.mxu1 %v2722_v52 }
 0x17c   :  { %1230 = vmatpush1.bf16.msra.mxu1 %v2720_v58 }
 0x17d   :  { %1231 = vmatprep.subr.bf16.mxu1 %v2725_v60  ;;  %v2775_v60 = vld [vmem:[%s3506_s5 + $0x8] sm:$0xff]  }
 0x17f   :  { %1086 = vmatmul.mubr.bf16.gmra.mrb[8].mxu1 %v3131_v47 }
 0x180   :  { %1232 = vmatpush1.bf16.msra.mxu1 %v2723_v62  ;;  %1095 = vmatprep.mubr.bf16.mxu1 %v2799_v59 }
 0x181   :  { %1233 = vmatprep.subr.bf16.mxu1 %v2728_v0 }
 0x184   :  { %1234 = vmatpush1.bf16.msra.mxu1 %v2726_v2 }
 0x185   :  { %1235 = vmatprep.subr.bf16.mxu1 %v2731_v3 }
 0x187   :  { %1096 = vmatmul.mubr.bf16.gmra.mrb[12].mxu1 %v3159_v15 }
 0x188   :  { %1236 = vmatpush1.bf16.msra.mxu1 %v2729_v5  ;;  %1255 = vmatprep.mubr.bf16.mxu1 %v2799_v59 }
 0x189   :  { %1237 = vmatprep.subr.bf16.mxu1 %v2734_v6 }
 0x18c   :  { %1238 = vmatpush1.bf16.msra.mxu1 %v2732_v7 }
 0x18d   :  { %1413 = vmatprep.subr.bf16.mxu1 %v2737_v9  ;;  %v2777_v9 = vld [vmem:[%s3506_s5 + $0x10] sm:$0xff]  }
 0x18f   :  { %1256 = vmatmul.mubr.bf16.vlgmr.msra.gmra.mrb[0].mxu1 %v3094_v4  ;;  %v2746_v4 = vld [vmem:[%s3504_s3 + $0x234] ss:$8 sps:$4 sm:$0xff]  }
 0x190   :  { %1414 = vmatpush1.bf16.msra.mxu1 %v2735_v10  ;;  %1265 = vmatprep.mubr.bf16.mxu1 %v2799_v59 }
 0x191   :  { %1415 = vmatprep.subr.bf16.mxu1 %v2740_v11 }
 0x194   :  { %1416 = vmatpush1.bf16.msra.mxu1 %v2738_v12 }
 0x195   :  { %1417 = vmatprep.subr.bf16.mxu1 %v2743_v13 }
 0x197   :  { %1266 = vmatmul.mubr.bf16.gmra.mrb[4].mxu1 %v3125_v36  ;;  %v2752_v36 = vld [vmem:[%s3504_s3 + $0x254] ss:$8 sps:$4 sm:$0xff]  }
 0x198   :  { %1418 = vmatpush1.bf16.msra.mxu1 %v2741_v14  ;;  %1275 = vmatprep.mubr.bf16.mxu1 %v2799_v59  ;;  %v2778_v14 = vld [vmem:[%s3506_s5 + $0x18] sm:$0xff]  }
 0x199   :  { %1419 = vmatprep.subr.bf16.mxu1 %v2746_v4 }
 0x19c   :  { %1420 = vmatpush1.bf16.msra.mxu1 %v2744_v16  ;;  %v2779_v16 = vld [vmem:[%s3506_s5 + $0x20] sm:$0xff]  }
 0x19d   :  { %1421 = vmatprep.subr.bf16.mxu1 %v2749_v17  ;;  %v2780_v17 = vld [vmem:[%s3506_s5 + $0x28] sm:$0xff]  }
 0x19f   :  { %1276 = vmatmul.mubr.bf16.gmra.mrb[8].mxu1 %v3136_v61  ;;  %v2758_v61 = vld [vmem:[%s3504_s3 + $0x274] ss:$8 sps:$4 sm:$0xff]  }
 0x1a0   :  { %1422 = vmatpush1.bf16.msra.mxu1 %v2747_v20  ;;  %1285 = vmatprep.mubr.bf16.mxu1 %v2799_v59  ;;  %v2781_v20 = vld [vmem:[%s3506_s5 + $0x30] sm:$0xff]  }
 0x1a1   :  { %1423 = vmatprep.subr.bf16.mxu1 %v2752_v36  ;;  %v2782_v36 = vld [vmem:[%s3506_s5 + $0x38] sm:$0xff]  }
 0x1a4   :  { %1424 = vmatpush1.bf16.msra.mxu1 %v2750_v21 }
 0x1a5   :  { %1425 = vmatprep.subr.bf16.mxu1 %v2755_v24  ;;  %v2783_v24 = vld [vmem:[%s3506_s5 + $0xc0] sm:$0xff]  }
 0x1a7   :  { %1286 = vmatmul.mubr.bf16.gmra.mrb[12].mxu1 %v2374_v34 }
 0x1a8   :  { %1426 = vmatpush1.bf16.msra.mxu1 %v2753_v25  ;;  %1445 = vmatprep.mubr.bf16.mxu1 %v2799_v59 }
 0x1a9   :  { %1427 = vmatprep.subr.bf16.mxu1 %v2758_v61  ;;  %v2784_v61 = vld [vmem:[%s3506_s5 + $0xc8] sm:$0xff]  }
 0x1ac   :  { %1428 = vmatpush1.bf16.msra.mxu1 %v2756_v18  ;;  %v2785_v18 = vld [vmem:[%s3506_s5 + $0xd0] sm:$0xff]  }
 0x1ad   :  { %2457 = vmatprep.subr.bf16.mxu1 %v2800_v63 }
 0x1af   :  { %1446 = vmatmul.mubr.bf16.vlgmr.msra.gmra.mrb[0].mxu1 %v3115_v22  ;;  %v2767_v22 = vld [vmem:[%s3506_s5 + $0x88] sm:$0xff]  }
 0x1b0   :  { %1455 = vmatprep.mubr.bf16.mxu1 %v2799_v59  ;;  %2458 = vmatpush3.bf16.msra.mxu1 %v2766_v19  ;;  %v2786_v19 = vld [vmem:[%s3506_s5 + $0xd8] sm:$0xff]  }
 0x1b1   :  { %2459 = vmatprep.subr.bf16.mxu1 %v2800_v63 }
 0x1b4   :  { %2460 = vmatpush3.bf16.msra.mxu1 %v2767_v22  ;;  %v2787_v22 = vld [vmem:[%s3506_s5 + $0xe0] sm:$0xff]  }
 0x1b5   :  { %2461 = vmatprep.subr.bf16.mxu1 %v2800_v63 }
 0x1b7   :  { %1456 = vmatmul.mubr.bf16.gmra.mrb[4].mxu1 %v3131_v47  ;;  %v2768_v47 = vld [vmem:[%s3506_s5 + $0x90] sm:$0xff]  }
 0x1b8   :  { %1465 = vmatprep.mubr.bf16.mxu1 %v2799_v59  ;;  %2462 = vmatpush3.bf16.msra.mxu1 %v2768_v47  ;;  %v2788_v47 = vld [vmem:[%s3506_s5 + $0xe8] sm:$0xff]  }
 0x1b9   :  { %2463 = vmatprep.subr.bf16.mxu1 %v2800_v63 }
 0x1bf   :  { %1466 = vmatmul.mubr.bf16.gmra.mrb[8].mxu1 %v3159_v15  ;;  %v2771_v15 = vld [vmem:[%s3506_s5 + $0xa0] sm:$0xff]  }
 0x1c0   :  { %1475 = vmatprep.mubr.bf16.mxu1 %v2799_v59  ;;  %v2770_v59 = vld [vmem:[%s3506_s5 + $0x98] sm:$0xff]  }
 0x1c1   :  { %2464 = vmatpush3.bf16.msra.mxu1 %v2770_v59  ;;  %v2789_v59 = vld [vmem:[%s3506_s5 + $0xf0] sm:$0xff]  }
 0x1c2   :  { %2465 = vmatprep.subr.bf16.mxu1 %v2800_v63 }
 0x1c5   :  { %2466 = vmatpush3.bf16.msra.mxu1 %v2771_v15 }
 0x1c6   :  { %2467 = vmatprep.subr.bf16.mxu1 %v2800_v63 }
 0x1c7   :  { %1476 = vmatmul.mubr.bf16.gmra.mrb[12].mxu1 %v2375_v44 }
 0x1c8   :  { %2473 = vmatprep.mubr.msk.bf16.mxu1 %vm2801_vm2, %v2800_v63 }
 0x1c9   :  { %2468 = vmatpush3.bf16.msra.mxu1 %v2772_v23 }
 0x1ca   :  { %2469 = vmatprep.subr.bf16.mxu1 %v2800_v63 }
 0x1cd   :  { %2470 = vmatpush3.bf16.msra.mxu1 %v2774_v26  ;;  %v2791_v26 = vld [vmem:[%s3508_s7] sm:$0xff]  }
 0x1ce   :  { %2471 = vmatprep.subr.bf16.mxu1 %v2800_v63 }
 0x1d1   :  { %2472 = vmatpush3.bf16.msra.mxu1 %v2776_v27  ;;  %v2792_v27 = vld [vmem:[%s3508_s7 + $0x8] sm:$0xff]  }
 0x1d2   :  { %2497 = vmatprep.subr.bf16.mxu1 %v2800_v63 }
 0x282   :  { %v1447_v28 = vpop.f32.mrb[0].mxu1 }
 0x283   :  { %v1449_v29 = vpop.f32.mrb[1].mxu1 }
 0x284   :  { %v1502_v30 = vmax.f32 %v1447_v28, %v1449_v29  ;;  %v1451_v31 = vpop.f32.mrb[2].mxu1  ;;  %v2793_v28 = vld [vmem:[%s3508_s7 + $0x10] sm:$0xff]   ;;  %v2794_v29 = vld [vmem:[%s3508_s7 + $0x18] ss:$0 sps:$4 sm:$0x11]  }
 0x285   :  { %v1453_v33 = vpop.f32.mrb[3].mxu1 }
 0x286   :  { %v1503_v34 = vmax.f32 %v1451_v31, %v1453_v33  ;;  %v1517_v35 = vadd.f32 %v2277_v32, %v1502_v30  ;;  %v2009_v30 = vsel %vm2007_vm3, %v2794_v29, 0 }
 0x288   :  { %v1518_v37 = vadd.f32 %v2277_v32, %v1503_v34 }
 0x28a   :  { %v1525_v38 = vmax.f32 %v1517_v35, %v1518_v37  ;;  %v1457_v39 = vpop.f32.mrb[4].mxu1 }
 0x28b   :  { %v1459_v40 = vpop.f32.mrb[5].mxu1 }
 0x28c   :  { %v1504_v41 = vmax.f32 %v1457_v39, %v1459_v40  ;;  %v1461_v1 = vpop.f32.mrb[6].mxu1  ;;  %v1529_v21 = vmax.f32 %v1525_v38, 0.0 }
 0x28d   :  { %v1463_v42 = vpop.f32.mrb[7].mxu1 }
 0x28e   :  { %v1505_v43 = vmax.f32 %v1461_v1, %v1463_v42  ;;  %v1519_v44 = vadd.f32 %v2277_v32, %v1504_v41  ;;  %v1533_v25 = vpack.c.bf16 %v1529_v21, %v1529_v21 }
 0x290   :  { %v1520_v45 = vadd.f32 %v2277_v32, %v1505_v43 }
 0x292   :  { %v1526_v46 = vmax.f32 %v1519_v44, %v1520_v45  ;;  %v1467_v48 = vpop.f32.mrb[8].mxu1  ;;  %v2358_v45 = vld [vmem:[%s3509_s6] ss:$0 sm:$0xff] }
 0x293   :  { %v1469_v49 = vpop.f32.mrb[9].mxu1 }
 0x294   :  { %v1530_v50 = vmax.f32 %v1526_v46, 0.0  ;;  %v1506_v51 = vmax.f32 %v1467_v48, %v1469_v49  ;;  %v1471_v53 = vpop.f32.mrb[10].mxu1 }
 0x295   :  { %v1473_v54 = vpop.f32.mrb[11].mxu1 }
 0x296   :  { %v1534_v56 = vpack.c.bf16 %v1530_v50, %v1530_v50  ;;  %v1507_v57 = vmax.f32 %v1471_v53, %v1473_v54  ;;  %v1521_v52 = vadd.f32 %v2277_v32, %v1506_v51 }
 0x298   :  { %v1522_v58 = vadd.f32 %v2277_v32, %v1507_v57  ;;  %2434 = vmatmul.mubr.bf16.vlgmr.msra.gmra.mrb[48].mxu0 %v1534_v56 }
 0x299   :  { %2438 = vmatpush3.bf16.msra.mxu0 %v2773_v55  ;;  %2453 = vmatprep.mubr.msk.bf16.mxu0 %vm2801_vm2, %v2800_v63  ;;  %v2359_v55 = vld [vmem:[%s3510_s8] ss:$0 sm:$0xff] }
 0x29a   :  { %v1527_v62 = vmax.f32 %v1521_v52, %v1522_v58  ;;  %v1477_v0 = vpop.f32.mrb[12].mxu1  ;;  %2439 = vmatprep.subr.bf16.mxu0 %v2800_v63 }
 0x29b   :  { %v1479_v2 = vpop.f32.mrb[13].mxu1 }
 0x29c   :  { %v1531_v3 = vmax.f32 %v1527_v62, 0.0  ;;  %v1508_v5 = vmax.f32 %v1477_v0, %v1479_v2  ;;  %v1481_v6 = vpop.f32.mrb[14].mxu1 }
 0x29d   :  { %2440 = vmatpush3.bf16.msra.mxu0 %v2775_v60  ;;  %v1483_v7 = vpop.f32.mrb[15].mxu1 }
 0x29e   :  { %v1535_v10 = vpack.c.bf16 %v1531_v3, %v1531_v3  ;;  %v1523_v11 = vadd.f32 %v2277_v32, %v1508_v5  ;;  %v1509_v12 = vmax.f32 %v1481_v6, %v1483_v7  ;;  %2441 = vmatprep.subr.bf16.mxu0 %v2800_v63 }
 0x2a0   :  { %v1524_v13 = vadd.f32 %v2277_v32, %v1509_v12  ;;  %2474 = vmatmul.mubr.bf16.vlgmr.msra.gmra.mrb[16].mxu1 %v1535_v10 }
 0x2a1   :  { %2442 = vmatpush3.bf16.msra.mxu0 %v2777_v9  ;;  %2505 = vmatprep.mubr.msk.bf16.mxu1 %vm2801_vm2, %v2800_v63 }
 0x2a2   :  { %v1528_v4 = vmax.f32 %v1523_v11, %v1524_v13  ;;  %2443 = vmatprep.subr.bf16.mxu0 %v2800_v63  ;;  %2498 = vmatpush3.bf16.msra.mxu1 %v2791_v26 }
 0x2a3   :  { %2499 = vmatprep.subr.bf16.mxu1 %v2800_v63 }
 0x2a4   :  { %v1532_v15 = vmax.f32 %v1528_v4, 0.0 }
 0x2a5   :  { %2444 = vmatpush3.bf16.msra.mxu0 %v2778_v14 }
 0x2a6   :  { %2445 = vmatprep.subr.bf16.mxu0 %v2800_v63  ;;  %v1536_v23 = vpack.c.bf16 %v1532_v15, %v1532_v15  ;;  %2500 = vmatpush3.bf16.msra.mxu1 %v2792_v27 }
 0x2a7   :  { %2501 = vmatprep.subr.bf16.mxu1 %v2800_v63 }
 0x2a9   :  { %2446 = vmatpush3.bf16.msra.mxu0 %v2779_v16 }
 0x2aa   :  { %2447 = vmatprep.subr.bf16.mxu0 %v2800_v63  ;;  %2502 = vmatpush3.bf16.msra.mxu1 %v2793_v28 }
 0x2ab   :  { %2503 = vmatprep.subr.bf16.mxu1 %v2800_v63 }
 0x2ad   :  { %2448 = vmatpush3.bf16.msra.mxu0 %v2780_v17 }
 0x2ae   :  { %2449 = vmatprep.subr.bf16.mxu0 %v2800_v63  ;;  %2504 = vmatpush3.bf16.msra.mxu1 %v2009_v30 }
 0x2b1   :  { %2450 = vmatpush3.bf16.msra.mxu0 %v2781_v20 }
 0x2b2   :  { %2451 = vmatprep.subr.bf16.mxu0 %v2800_v63 }
 0x2b5   :  { %2452 = vmatpush3.bf16.msra.mxu0 %v2782_v36 }
 0x2b6   :  { %2477 = vmatprep.subr.bf16.mxu0 %v2800_v63 }
 0x2b8   :  { %2454 = vmatmul.mubr.bf16.vlgmr.msra.gmra.mrb[52].mxu0 %v1533_v25 }
 0x2b9   :  { %2478 = vmatpush3.bf16.msra.mxu0 %v2783_v24  ;;  %2493 = vmatprep.mubr.msk.bf16.mxu0 %vm2801_vm2, %v2800_v63 }
 0x2ba   :  { %2479 = vmatprep.subr.bf16.mxu0 %v2800_v63 }
 0x2bd   :  { %2480 = vmatpush3.bf16.msra.mxu0 %v2784_v61 }
 0x2be   :  { %2481 = vmatprep.subr.bf16.mxu0 %v2800_v63 }
 0x2c1   :  { %2482 = vmatpush3.bf16.msra.mxu0 %v2785_v18 }
 0x2c2   :  { %2483 = vmatprep.subr.bf16.mxu0 %v2800_v63 }
 0x2c5   :  { %2484 = vmatpush3.bf16.msra.mxu0 %v2786_v19 }
 0x2c6   :  { %2485 = vmatprep.subr.bf16.mxu0 %v2800_v63 }
 0x2c9   :  { %2486 = vmatpush3.bf16.msra.mxu0 %v2787_v22 }
 0x2ca   :  { %2487 = vmatprep.subr.bf16.mxu0 %v2800_v63 }
 0x2cd   :  { %2488 = vmatpush3.bf16.msra.mxu0 %v2788_v47 }
 0x2ce   :  { %2489 = vmatprep.subr.bf16.mxu0 %v2800_v63 }
 0x2d1   :  { %2490 = vmatpush3.bf16.msra.mxu0 %v2789_v59 }
 0x2d2   :  { %2491 = vmatprep.subr.bf16.mxu0 %v2800_v63 }
 0x2d5   :  { %2492 = vmatpush3.bf16.msra.mxu0 %v2790_v8 }
 0x2d8   :  { %2494 = vmatmul.mubr.bf16.vlgmr.msra.gmra.mrb[56].mxu0 %v1536_v23 }
 0x36b   :  { %v1652_v31 = vpop.f32.mrb[48].mxu0 }
 0x36c   :  { %v2435_v32 = vpop.f32.mrb[49].mxu0 }
 0x36d   :  { %v1655_v33 = vpop.f32.mrb[50].mxu0 }
 0x36e   :  { %v2436_v34 = vpop.f32.mrb[51].mxu0 }
 0x373   :  { %v1845_v35 = vpop.f32.mrb[16].mxu1 }
 0x374   :  { %v2475_v37 = vpop.f32.mrb[17].mxu1 }
 0x375   :  { %v1848_v38 = vpop.f32.mrb[18].mxu1 }
 0x376   :  { %v2476_v39 = vpop.f32.mrb[19].mxu1 }
 0x38b   :  { %v1740_v40 = vpop.f32.mrb[52].mxu0 }
 0x38c   :  { %v1741_v41 = vadd.f32 %v1740_v40, %v1652_v31  ;;  %v2455_v1 = vpop.f32.mrb[53].mxu0 }
 0x38d   :  { %v1743_v42 = vpop.f32.mrb[54].mxu0 }
 0x38e   :  { %v2456_v63 = vpop.f32.mrb[55].mxu0  ;;  %v1851_v43 = vadd.f32 %v1845_v35, %v1741_v41 }
 0x3ab   :  { %v1951_v44 = vpop.f32.mrb[56].mxu0 }
 0x3ac   :  { %v1957_v46 = vadd.f32 %v1951_v44, %v1851_v43  ;;  %v2495_v48 = vpop.f32.mrb[57].mxu0 }
 0x3ad   :  { %v1954_v49 = vpop.f32.mrb[58].mxu0 }
 0x3ae   :  { %v1965_v50 = vadd.f32 %v2358_v45, %v1957_v46  ;;  %v2496_v51 = vpop.f32.mrb[59].mxu0 }
 0x3b0   :  { %v1966_v53 = vmax.f32 %v1965_v50, 0.0 }
 0x3b2   :  { %v1967_v54 = vpack.c.bf16 %v1966_v53, %v1966_v53 }
 0x3b4   :  { %2506 = vmatmul.mubr.msk.bf16.vlgmr.msra.gmra.mrb[20].mxu1 %vm2003_vm4, %v1967_v54 }
 0x487   :  { %v2045_v56 = vpop.f32.mrb[20].mxu1 }
 0x488   :  { %v2046_v57 = vadd.f32 %v2359_v55, %v2045_v56  ;;  %v2507_v52 = vpop.f32.mrb[21].mxu1 }
 0x489   :  { %v2048_v58 = vpop.f32.mrb[22].mxu1 }
 0x48a   :  { %2051 = vmax.xlane.f32.xlu0 %v2046_v57  ;;  %v2508_v60 = vpop.f32.mrb[23].mxu1 }
 0x517   :  { %v2052_v62 = vpop.xlane.xlu0 %2051 }
 0x518   :  { %v2053_v0 = vsub.f32 %v2046_v57, %v2052_v62 }
 0x51a   :  { %v2054_v2 = vmul.f32 1.442695, %v2053_v0 }
 0x51c   :  { %2795 = vpow2.f32 %v2054_v2 }
 0x526   :  { %v2796_v3 = vpop.eup %2795 }
 0x527   :  { %2056 = vadd.xlane.f32.xlu0 %v2796_v3 }
 0x5b4   :  { %v2057_v5 = vpop.xlane.xlu0 %2056 }
 0x5b5   :  { %2797 = vlog2.f32 %v2057_v5 }
 0x5bf   :  { %v2798_v6 = vpop.eup %2797 }
 0x5c0   :  { %v2059_v7 = vmul.f32 0.6931472, %v2798_v6 }
 0x5c2   :  { %v2060_v9 = vsub.f32 %v2053_v0, %v2059_v7 }
 0x5c4   :  { %2061 = vst [vmem:[%s3511_s9] sm:$0xff] %v2060_v9 }

</bundles_post_ra>
